<compile_context>
chip_gen: v5e
topology: v5e:2x2
jax: 0.10.0
libtpu: 0.0.40
codegen_flags: <defaults>
</compile_context>

<pallas_src>
import functools

import jax
import jax.numpy as jnp
from jax import lax
from jax.experimental import pallas as pl
from jax.experimental.pallas import tpu as pltpu


# --------------------------------------------------------------------------- #
# Kernel
# --------------------------------------------------------------------------- #
def _layer_norm(x, gamma, beta, eps=1e-5):
    # Single-pass variance: mean(x*x) - mean(x)^2 (biased, like torch).
    mean = jnp.mean(x, axis=-1, keepdims=True)
    var = jnp.maximum(jnp.mean(x * x, axis=-1, keepdims=True) - mean * mean, 0.0)
    return (x - mean) * lax.rsqrt(var + eps) * gamma + beta


def encoder_block_kernel(x_ref, wqkv_ref, wo_ref,
                         g1_ref, be1_ref, g2_ref, be2_ref,
                         w1_ref, b1_ref, w2_ref, b2_ref,
                         o_ref, *, head_num, approx):
    H = head_num
    bb, T, E = x_ref.shape
    dh = E // H
    cdt = wqkv_ref.dtype                        # matmul-operand dtype (f32/bf16)

    # Grid-invariant operands: hoisted loads.
    wqkv = wqkv_ref[...]                        # [E, 3E]  (q columns pre-scaled)
    wo = wo_ref[...]                            # [E, E]
    w1 = w1_ref[...]                            # [E, M]
    w2 = w2_ref[...]                            # [M, E]
    g1, be1 = g1_ref[...], be1_ref[...]
    g2, be2 = g2_ref[...], be2_ref[...]
    b1, b2 = b1_ref[...], b2_ref[...]

    def one_batch(bi, carry):
        x = x_ref[bi]                           # [T, E] fp32 (residual path)
        xc = x.astype(cdt)

        # ---- fused QKV projection: one lane-dense MXU matmul ----------------
        qkv = jnp.dot(xc, wqkv, preferred_element_type=jnp.float32)   # [T, 3E]
        q2d = qkv[:, 0:E]                       # columns ordered (head, dim)
        k2d = qkv[:, E:2 * E]
        v2d = qkv[:, 2 * E:3 * E]

        # Head split via static lane slices + leading-axis stack (cheap
        # relayout; all MXU work stays in the fused matmuls).
        def heads(a2d):
            return jnp.stack(
                [a2d[:, h * dh:(h + 1) * dh] for h in range(H)], axis=0)

        q, k, v = heads(q2d), heads(k2d), heads(v2d)          # [H, T, dh]

        # ---- attention (sqrt(dh) scale already folded into Wq) --------------
        energy = jnp.einsum('htd,hsd->hts', q.astype(cdt), k.astype(cdt),
                            preferred_element_type=jnp.float32)       # [H,T,T]
        energy = energy - jnp.max(energy, axis=-1, keepdims=True)
        p = jnp.exp(energy)
        attn = p * pl.reciprocal(jnp.sum(p, axis=-1, keepdims=True), approx=approx)
        ctx = jnp.einsum('hts,hsd->htd', attn.astype(cdt), v.astype(cdt),
                         preferred_element_type=jnp.float32)          # [H,T,dh]

        # ---- fused head-concat + output projection: [T,E] @ [E,E] -----------
        ctx2d = jnp.concatenate([ctx[h] for h in range(H)], axis=-1)  # (h d)
        attn_out = jnp.dot(ctx2d.astype(cdt), wo,
                           preferred_element_type=jnp.float32)        # [T, E]

        # dropout = identity (eval mode)
        x1 = _layer_norm(x + attn_out, g1, be1)

        # ---- MLP: Linear -> GELU(tanh) -> Linear -----------------------------
        h1 = jnp.dot(x1.astype(cdt), w1, preferred_element_type=jnp.float32) + b1
        h1 = jax.nn.gelu(h1, approximate=True)
        mlp = jnp.dot(h1.astype(cdt), w2, preferred_element_type=jnp.float32) + b2

        o_ref[bi] = _layer_norm(x1 + mlp, g2, be2).astype(o_ref.dtype)
        return carry

    if bb == 1:
        one_batch(0, 0)
    else:
        # fori_loop bounds per-batch-element live ranges (no vreg blow-up).
        lax.fori_loop(0, bb, one_batch, 0)


# --------------------------------------------------------------------------- #
# Wrapper glue (one-time weight re-layout + pallas_call)
# --------------------------------------------------------------------------- #
def _prepare_weights(params, head_num, compute_dtype):
    """Re-layout torch-style weights once, outside the kernel."""
    wqkv = params["wqkv"]                       # [3E, E] (torch [out, in])
    E = wqkv.shape[1]
    H = head_num
    dh = E // H
    # Torch fused-output index (rearrange 'b t (d k h) -> k b h t d'):
    #   o = d*(3H) + k*H + h.
    # Repack columns so the kernel sees [q | k | v], each section ordered
    # (h, d) — matching the 'b h t d -> b t (h d)' concat used before Wo.
    d_idx = jnp.arange(dh)
    h_idx = jnp.arange(H)
    k_idx = jnp.arange(3)
    rows = (d_idx[None, None, :] * (3 * H)
            + k_idx[:, None, None] * H
            + h_idx[None, :, None])             # [3, H, dh]
    w_sel = wqkv[rows.reshape(-1)]              # [3E, E], row order (k, h, d)
    # Fold the sqrt(d_head) score MULTIPLIER (module's self.dk) into Wq.
    scale = float(dh) ** 0.5
    col_scale = jnp.concatenate([jnp.full((E,), scale, jnp.float32),
                                 jnp.ones((2 * E,), jnp.float32)])
    wqkv_packed = (w_sel.T * col_scale[None, :]).astype(compute_dtype)  # [E, 3E]
    wo_t = params["wo"].T.astype(compute_dtype)                         # [E, E]
    w1t = params["w1"].T.astype(compute_dtype)                          # [E, M]
    w2t = params["w2"].T.astype(compute_dtype)                          # [M, E]
    return wqkv_packed, wo_t, w1t, w2t


def _round_up(v, m):
    return (v + m - 1) // m * m


def _padded_vmem_bytes(shape, dtype):
    """Bytes of one VMEM buffer after (8, 128) tile padding."""
    shape = tuple(shape)
    if len(shape) == 1:
        shape = (1,) + shape
    lead = 1
    for s in shape[:-2]:
        lead *= s
    return (lead * _round_up(shape[-2], 8) * _round_up(shape[-1], 128)
            * jnp.dtype(dtype).itemsize)


def _vmem_capacity_bytes():
    """Per-core VMEM capacity; conservative 64 MiB (v7x) if query fails."""
    try:
        info = pltpu.get_tpu_info()
        for name in ("vmem_capacity_bytes", "vmem_size_bytes", "vmem_bytes"):
            v = getattr(info, name, None)
            if v:
                return int(v)
    except Exception:
        pass
    return 64 << 20


def transformer_encoder_block(x, params, *, head_num,
                              compute_dtype=jnp.bfloat16, approx=True,
                              batch_block=1, single_buffer_weights=True):
    B, T, E = x.shape
    assert E % head_num == 0 and B % batch_block == 0
    H = head_num
    dh = E // H
    M = params["w1"].shape[0]

    wqkv_p, wo_t, w1t, w2t = _prepare_weights(params, H, compute_dtype)
    g1, be1 = params["g1"], params["be1"]
    g2, be2 = params["g2"], params["be2"]
    b1, b2 = params["bm1"], params["bm2"]

    kernel = functools.partial(encoder_block_kernel, head_num=H, approx=approx)
    ceiling = int(_vmem_capacity_bytes() * 0.85)      # headroom below physical

    def build(single_buffer):
        wdt = compute_dtype
        wbuf = 1 if single_buffer else 2
        weight_bytes = wbuf * (
            _padded_vmem_bytes((E, 3 * E), wdt)
            + _padded_vmem_bytes((E, E), wdt)
            + _padded_vmem_bytes((E, M), wdt)
            + _padded_vmem_bytes((M, E), wdt)
            + 5 * _padded_vmem_bytes((1, E), jnp.float32)
            + _padded_vmem_bytes((1, M), jnp.float32))
        io_bytes = 2 * 2 * _padded_vmem_bytes((batch_block, T, E), jnp.float32)
        # Single-iteration live set (fori_loop bounds live ranges for bb > 1).
        inter_bytes = (
            _padded_vmem_bytes((T, 3 * E), jnp.float32)
            + 3 * _padded_vmem_bytes((H, T, dh), jnp.float32)
            + 2 * _padded_vmem_bytes((H, T, T), jnp.float32)
            + 2 * _padded_vmem_bytes((T, M), jnp.float32)
            + 6 * _padded_vmem_bytes((T, E), jnp.float32))
        need = 2 * (weight_bytes + io_bytes + inter_bytes)    # 2x compile margin
        vmem_limit = int(max(min(need, ceiling), min(32 << 20, ceiling)))

        def inv(shape):
            idx = lambda b, n=len(shape): (0,) * n
            if single_buffer:
                return pl.BlockSpec(shape, idx, pipeline_mode=pl.Buffered(1))
            return pl.BlockSpec(shape, idx)

        return pl.pallas_call(
            kernel,
            out_shape=jax.ShapeDtypeStruct((B, T, E), jnp.float32),
            grid=(B // batch_block,),
            in_specs=[
                pl.BlockSpec((batch_block, T, E), lambda b: (b, 0, 0)),   # x
                inv((E, 3 * E)),                                          # Wqkv packed
                inv((E, E)),                                              # Wo^T
                inv((1, E)), inv((1, E)),                                 # LN1 g/b
                inv((1, E)), inv((1, E)),                                 # LN2 g/b
                inv((E, M)), inv((1, M)),                                 # MLP W1^T/b1
                inv((M, E)), inv((1, E)),                                 # MLP W2^T/b2
            ],
            out_specs=pl.BlockSpec((batch_block, T, E), lambda b: (b, 0, 0)),
            compiler_params=pltpu.CompilerParams(
                dimension_semantics=("parallel",),
                vmem_limit_bytes=vmem_limit),
        )

    args = (x, wqkv_p, wo_t, g1, be1, g2, be2, w1t, b1, w2t, b2)
    if single_buffer_weights:
        try:
            return build(True)(*args)
        except Exception:
            # TODO(synk): pipeline_mode=pl.Buffered(1) rejected by this JAX
            # build -> fall back to default (double) buffering of weights.
            pass
    return build(False)(*args)


# --------------------------------------------------------------------------- #
# Parameters + pure-JAX reference (verification)
# --------------------------------------------------------------------------- #
def make_params(key, embedding_dim, head_num, mlp_dim):
    E, M = embedding_dim, mlp_dim
    ks = jax.random.split(key, 6)
    wqkv = jax.random.normal(ks[0], (3 * E, E), jnp.float32) * 0.05  # torch [out,in]
    wo = jax.random.normal(ks[1], (E, E), jnp.float32) * 0.05
    w1 = jax.random.normal(ks[2], (M, E), jnp.float32) * 0.05
    bm1 = jax.random.normal(ks[3], (M,), jnp.float32) * 0.01
    w2 = jax.random.normal(ks[4], (E, M), jnp.float32) * 0.05
    bm2 = jax.random.normal(ks[5], (E,), jnp.float32) * 0.01
    return dict(
        wqkv=wqkv, wo=wo,
        g1=jnp.ones((1, E), jnp.float32), be1=jnp.zeros((1, E), jnp.float32),
        g2=jnp.ones((1, E), jnp.float32), be2=jnp.zeros((1, E), jnp.float32),
        w1=w1, bm1=bm1.reshape(1, M), w2=w2, bm2=bm2.reshape(1, E),
    )


def reference_forward(x, params, *, head_num, approximate_gelu=False):
    """Pure-JAX replica of the PyTorch module (eval mode)."""
    B, T, E = x.shape
    H = head_num
    dh = E // H
    scale = dh ** 0.5                                            # module's self.dk
    qkv = x @ params["wqkv"].T                                   # [B,T,3E]
    qkv = qkv.reshape(B, T, dh, 3, H)                            # (d k h)
    qkv = jnp.transpose(qkv, (3, 0, 4, 1, 2))                    # k b h t d
    q, k, v = qkv[0], qkv[1], qkv[2]
    energy = jnp.einsum('bhid,bhjd->bhij', q, k) * scale
    attn = jax.nn.softmax(energy, axis=-1)
    o = jnp.einsum('bhij,bhjd->bhid', attn, v)
    o = jnp.transpose(o, (0, 2, 1, 3)).reshape(B, T, E)          # (h d)
    o = o @ params["wo"].T
    x1 = x + o
    mean = x1.mean(-1, keepdims=True); var = ((x1 - mean) ** 2).mean(-1, keepdims=True)
    x1 = (x1 - mean) / jnp.sqrt(var + 1e-5) * params["g1"] + params["be1"]
    h = jax.nn.gelu(x1 @ params["w1"].T + params["bm1"], approximate=approximate_gelu)
    m = h @ params["w2"].T + params["bm2"]
    x2 = x1 + m
    mean = x2.mean(-1, keepdims=True); var = ((x2 - mean) ** 2).mean(-1, keepdims=True)
    return (x2 - mean) / jnp.sqrt(var + 1e-5) * params["g2"] + params["be2"]


if __name__ == "__main__":
    B, T, E, H, M = 2, 8, 32, 4, 64
    key = jax.random.PRNGKey(0)
    kx, kp = jax.random.split(key)
    x = jax.random.normal(kx, (B, T, E), jnp.float32)
    params = make_params(kp, E, H, M)

    ref_exact = reference_forward(x, params, head_num=H, approximate_gelu=False)
    ref_tanh = reference_forward(x, params, head_num=H, approximate_gelu=True)

    # fp32 verification path (exact reciprocal); grid=(B,)=(2,) keeps both v7x
    # TensorCores fed.  Tight check vs the tanh-GELU reference; loose check vs
    # the exact-GELU (true PyTorch) reference documents the activation approx.
    out_fp32 = jax.block_until_ready(
        transformer_encoder_block(x, params, head_num=H,
                                  compute_dtype=jnp.float32, approx=False))
    assert out_fp32.shape == (B, T, E)
    err = float(jnp.max(jnp.abs(out_fp32 - ref_tanh)))
    assert jnp.allclose(out_fp32, ref_tanh, atol=2e-4, rtol=2e-4), err
    err_exact = float(jnp.max(jnp.abs(out_fp32 - ref_exact)))
    assert jnp.allclose(out_fp32, ref_exact, atol=1e-2, rtol=1e-2), err_exact

    # Default performance path: bf16 MXU operands + approx EUP activations,
    # batch_block=1 so grid=(2,) stays >= 2 parallel points.
    out_bf16 = jax.block_until_ready(
        transformer_encoder_block(x, params, head_num=H))
    assert out_bf16.shape == (B, T, E)
    err_bf = float(jnp.max(jnp.abs(out_bf16 - ref_exact)))
    assert jnp.allclose(out_bf16, ref_exact, atol=7e-2, rtol=7e-2), err_bf

    print("KERNEL_OK")
</pallas_src>

<mosaic_0001>
module attributes {stable_mosaic.version = 11 : i64} {
  func.func @encoder_block_kernel(%arg0: i32, %arg1: memref<1x8x32xf32, #tpu.memory_space<vmem>>, %arg2: memref<32x96xf32, #tpu.memory_space<vmem>>, %arg3: memref<32x32xf32, #tpu.memory_space<vmem>>, %arg4: memref<1x32xf32, #tpu.memory_space<vmem>>, %arg5: memref<1x32xf32, #tpu.memory_space<vmem>>, %arg6: memref<1x32xf32, #tpu.memory_space<vmem>>, %arg7: memref<1x32xf32, #tpu.memory_space<vmem>>, %arg8: memref<32x64xf32, #tpu.memory_space<vmem>>, %arg9: memref<1x64xf32, #tpu.memory_space<vmem>>, %arg10: memref<64x32xf32, #tpu.memory_space<vmem>>, %arg11: memref<1x32xf32, #tpu.memory_space<vmem>>, %arg12: memref<1x8x32xf32, #tpu.memory_space<vmem>>) attributes {dimension_semantics = [#tpu.dimension_semantics<parallel>], iteration_bounds = array<i64: 2>, scalar_prefetch = 0 : i64, scratch_operands = 0 : i64, tpu.core_type = #tpu.core_type<tc>, window_params = [{transform_indices = @transform_0, window_bounds = array<i64: 1, 8, 32>}, {pipeline_mode = #tpu.pipeline_mode<synchronous>, transform_indices = @transform_1, window_bounds = array<i64: 32, 96>}, {pipeline_mode = #tpu.pipeline_mode<synchronous>, transform_indices = @transform_2, window_bounds = array<i64: 32, 32>}, {pipeline_mode = #tpu.pipeline_mode<synchronous>, transform_indices = @transform_3, window_bounds = array<i64: 1, 32>}, {pipeline_mode = #tpu.pipeline_mode<synchronous>, transform_indices = @transform_4, window_bounds = array<i64: 1, 32>}, {pipeline_mode = #tpu.pipeline_mode<synchronous>, transform_indices = @transform_5, window_bounds = array<i64: 1, 32>}, {pipeline_mode = #tpu.pipeline_mode<synchronous>, transform_indices = @transform_6, window_bounds = array<i64: 1, 32>}, {pipeline_mode = #tpu.pipeline_mode<synchronous>, transform_indices = @transform_7, window_bounds = array<i64: 32, 64>}, {pipeline_mode = #tpu.pipeline_mode<synchronous>, transform_indices = @transform_8, window_bounds = array<i64: 1, 64>}, {pipeline_mode = #tpu.pipeline_mode<synchronous>, transform_indices = @transform_9, window_bounds = array<i64: 64, 32>}, {pipeline_mode = #tpu.pipeline_mode<synchronous>, transform_indices = @transform_10, window_bounds = array<i64: 1, 32>}, {transform_indices = @transform_11, window_bounds = array<i64: 1, 8, 32>}]} {
    %c0 = arith.constant 0 : index
    %c0_0 = arith.constant 0 : index
    %0 = vector.load %arg2[%c0, %c0_0] : memref<32x96xf32, #tpu.memory_space<vmem>>, vector<32x96xf32>
    %c0_1 = arith.constant 0 : index
    %c0_2 = arith.constant 0 : index
    %1 = vector.load %arg3[%c0_1, %c0_2] : memref<32x32xf32, #tpu.memory_space<vmem>>, vector<32x32xf32>
    %c0_3 = arith.constant 0 : index
    %c0_4 = arith.constant 0 : index
    %2 = vector.load %arg8[%c0_3, %c0_4] : memref<32x64xf32, #tpu.memory_space<vmem>>, vector<32x64xf32>
    %c0_5 = arith.constant 0 : index
    %c0_6 = arith.constant 0 : index
    %3 = vector.load %arg10[%c0_5, %c0_6] : memref<64x32xf32, #tpu.memory_space<vmem>>, vector<64x32xf32>
    %c0_7 = arith.constant 0 : index
    %c0_8 = arith.constant 0 : index
    %4 = vector.load %arg4[%c0_7, %c0_8] : memref<1x32xf32, #tpu.memory_space<vmem>>, vector<1x32xf32>
    %c0_9 = arith.constant 0 : index
    %c0_10 = arith.constant 0 : index
    %5 = vector.load %arg5[%c0_9, %c0_10] : memref<1x32xf32, #tpu.memory_space<vmem>>, vector<1x32xf32>
    %c0_11 = arith.constant 0 : index
    %c0_12 = arith.constant 0 : index
    %6 = vector.load %arg6[%c0_11, %c0_12] : memref<1x32xf32, #tpu.memory_space<vmem>>, vector<1x32xf32>
    %c0_13 = arith.constant 0 : index
    %c0_14 = arith.constant 0 : index
    %7 = vector.load %arg7[%c0_13, %c0_14] : memref<1x32xf32, #tpu.memory_space<vmem>>, vector<1x32xf32>
    %c0_15 = arith.constant 0 : index
    %c0_16 = arith.constant 0 : index
    %8 = vector.load %arg9[%c0_15, %c0_16] : memref<1x64xf32, #tpu.memory_space<vmem>>, vector<1x64xf32>
    %c0_17 = arith.constant 0 : index
    %c0_18 = arith.constant 0 : index
    %9 = vector.load %arg11[%c0_17, %c0_18] : memref<1x32xf32, #tpu.memory_space<vmem>>, vector<1x32xf32>
    %c0_19 = arith.constant 0 : index
    %c0_20 = arith.constant 0 : index
    %c0_21 = arith.constant 0 : index
    %10 = vector.load %arg1[%c0_19, %c0_20, %c0_21] : memref<1x8x32xf32, #tpu.memory_space<vmem>>, vector<1x8x32xf32>
    %11 = vector.shape_cast %10 : vector<1x8x32xf32> to vector<8x32xf32>
    %cst = arith.constant dense<0.000000e+00> : vector<8x96xf32>
    %12 = tpu.matmul %11, %0, %cst {dimension_numbers = #tpu.dot_dimension_numbers<[1], [0], [0], [1], [0, 0, 1, 1], [], []>} : vector<8x32xf32>, vector<32x96xf32>, vector<8x96xf32> -> vector<8x96xf32>
    %13 = vector.extract_strided_slice %12 {offsets = [0, 0], sizes = [8, 32], strides = [1, 1]} : vector<8x96xf32> to vector<8x32xf32>
    %14 = vector.extract_strided_slice %12 {offsets = [0, 32], sizes = [8, 32], strides = [1, 1]} : vector<8x96xf32> to vector<8x32xf32>
    %15 = vector.extract_strided_slice %12 {offsets = [0, 64], sizes = [8, 32], strides = [1, 1]} : vector<8x96xf32> to vector<8x32xf32>
    %16 = vector.extract_strided_slice %13 {offsets = [0, 0], sizes = [8, 8], strides = [1, 1]} : vector<8x32xf32> to vector<8x8xf32>
    %17 = vector.extract_strided_slice %13 {offsets = [0, 8], sizes = [8, 8], strides = [1, 1]} : vector<8x32xf32> to vector<8x8xf32>
    %18 = vector.extract_strided_slice %13 {offsets = [0, 16], sizes = [8, 8], strides = [1, 1]} : vector<8x32xf32> to vector<8x8xf32>
    %19 = vector.extract_strided_slice %13 {offsets = [0, 24], sizes = [8, 8], strides = [1, 1]} : vector<8x32xf32> to vector<8x8xf32>
    %20 = vector.shape_cast %16 : vector<8x8xf32> to vector<1x8x8xf32>
    %21 = vector.shape_cast %17 : vector<8x8xf32> to vector<1x8x8xf32>
    %22 = vector.shape_cast %18 : vector<8x8xf32> to vector<1x8x8xf32>
    %23 = vector.shape_cast %19 : vector<8x8xf32> to vector<1x8x8xf32>
    %24 = tpu.concatenate %20, %21, %22, %23 in 0 : vector<1x8x8xf32>, vector<1x8x8xf32>, vector<1x8x8xf32>, vector<1x8x8xf32> -> vector<4x8x8xf32>
    %25 = vector.extract_strided_slice %14 {offsets = [0, 0], sizes = [8, 8], strides = [1, 1]} : vector<8x32xf32> to vector<8x8xf32>
    %26 = vector.extract_strided_slice %14 {offsets = [0, 8], sizes = [8, 8], strides = [1, 1]} : vector<8x32xf32> to vector<8x8xf32>
    %27 = vector.extract_strided_slice %14 {offsets = [0, 16], sizes = [8, 8], strides = [1, 1]} : vector<8x32xf32> to vector<8x8xf32>
    %28 = vector.extract_strided_slice %14 {offsets = [0, 24], sizes = [8, 8], strides = [1, 1]} : vector<8x32xf32> to vector<8x8xf32>
    %29 = vector.shape_cast %25 : vector<8x8xf32> to vector<1x8x8xf32>
    %30 = vector.shape_cast %26 : vector<8x8xf32> to vector<1x8x8xf32>
    %31 = vector.shape_cast %27 : vector<8x8xf32> to vector<1x8x8xf32>
    %32 = vector.shape_cast %28 : vector<8x8xf32> to vector<1x8x8xf32>
    %33 = tpu.concatenate %29, %30, %31, %32 in 0 : vector<1x8x8xf32>, vector<1x8x8xf32>, vector<1x8x8xf32>, vector<1x8x8xf32> -> vector<4x8x8xf32>
    %34 = vector.extract_strided_slice %15 {offsets = [0, 0], sizes = [8, 8], strides = [1, 1]} : vector<8x32xf32> to vector<8x8xf32>
    %35 = vector.extract_strided_slice %15 {offsets = [0, 8], sizes = [8, 8], strides = [1, 1]} : vector<8x32xf32> to vector<8x8xf32>
    %36 = vector.extract_strided_slice %15 {offsets = [0, 16], sizes = [8, 8], strides = [1, 1]} : vector<8x32xf32> to vector<8x8xf32>
    %37 = vector.extract_strided_slice %15 {offsets = [0, 24], sizes = [8, 8], strides = [1, 1]} : vector<8x32xf32> to vector<8x8xf32>
    %38 = vector.shape_cast %34 : vector<8x8xf32> to vector<1x8x8xf32>
    %39 = vector.shape_cast %35 : vector<8x8xf32> to vector<1x8x8xf32>
    %40 = vector.shape_cast %36 : vector<8x8xf32> to vector<1x8x8xf32>
    %41 = vector.shape_cast %37 : vector<8x8xf32> to vector<1x8x8xf32>
    %42 = tpu.concatenate %38, %39, %40, %41 in 0 : vector<1x8x8xf32>, vector<1x8x8xf32>, vector<1x8x8xf32>, vector<1x8x8xf32> -> vector<4x8x8xf32>
    "tpu.trace_start"() <{level = 10 : i32, message = "htd,hsd->hts"}> : () -> ()
    %cst_22 = arith.constant dense<0.000000e+00> : vector<4x8x8xf32>
    %43 = tpu.matmul %24, %33, %cst_22 {dimension_numbers = #tpu.dot_dimension_numbers<[2], [2], [1], [1], [0, 0, 0, 1, 1, 1], [0], [0]>} : vector<4x8x8xf32>, vector<4x8x8xf32>, vector<4x8x8xf32> -> vector<4x8x8xf32>
    "tpu.trace_stop"() : () -> ()
    %cst_23 = arith.constant dense<0xFF800000> : vector<4x8xf32>
    %44 = vector.multi_reduction <maximumf>, %43, %cst_23 [2] : vector<4x8x8xf32> to vector<4x8xf32>
    %45 = vector.shape_cast %44 : vector<4x8xf32> to vector<4x8x1xf32>
    %46 = vector.broadcast %45 : vector<4x8x1xf32> to vector<4x8x8xf32>
    %47 = arith.subf %43, %46 : vector<4x8x8xf32>
    %48 = math.exp %47 : vector<4x8x8xf32>
    %cst_24 = arith.constant dense<0.000000e+00> : vector<4x8xf32>
    %49 = vector.multi_reduction <add>, %48, %cst_24 [2] : vector<4x8x8xf32> to vector<4x8xf32>
    %50 = vector.shape_cast %49 : vector<4x8xf32> to vector<4x8x1xf32>
    %51 = tpu.reciprocal %50 : vector<4x8x1xf32> -> vector<4x8x1xf32>
    %52 = vector.broadcast %51 : vector<4x8x1xf32> to vector<4x8x8xf32>
    %53 = arith.mulf %48, %52 : vector<4x8x8xf32>
    "tpu.trace_start"() <{level = 10 : i32, message = "hts,hsd->htd"}> : () -> ()
    %cst_25 = arith.constant dense<0.000000e+00> : vector<4x8x8xf32>
    %54 = tpu.matmul %53, %42, %cst_25 {dimension_numbers = #tpu.dot_dimension_numbers<[2], [1], [1], [2], [0, 0, 0, 1, 1, 2], [0], [0]>} : vector<4x8x8xf32>, vector<4x8x8xf32>, vector<4x8x8xf32> -> vector<4x8x8xf32>
    "tpu.trace_stop"() : () -> ()
    %55 = vector.extract_strided_slice %54 {offsets = [0, 0, 0], sizes = [1, 8, 8], strides = [1, 1, 1]} : vector<4x8x8xf32> to vector<1x8x8xf32>
    %56 = vector.shape_cast %55 : vector<1x8x8xf32> to vector<8x8xf32>
    %57 = vector.extract_strided_slice %54 {offsets = [1, 0, 0], sizes = [1, 8, 8], strides = [1, 1, 1]} : vector<4x8x8xf32> to vector<1x8x8xf32>
    %58 = vector.shape_cast %57 : vector<1x8x8xf32> to vector<8x8xf32>
    %59 = vector.extract_strided_slice %54 {offsets = [2, 0, 0], sizes = [1, 8, 8], strides = [1, 1, 1]} : vector<4x8x8xf32> to vector<1x8x8xf32>
    %60 = vector.shape_cast %59 : vector<1x8x8xf32> to vector<8x8xf32>
    %61 = vector.extract_strided_slice %54 {offsets = [3, 0, 0], sizes = [1, 8, 8], strides = [1, 1, 1]} : vector<4x8x8xf32> to vector<1x8x8xf32>
    %62 = vector.shape_cast %61 : vector<1x8x8xf32> to vector<8x8xf32>
    %63 = tpu.concatenate %56, %58, %60, %62 in 1 : vector<8x8xf32>, vector<8x8xf32>, vector<8x8xf32>, vector<8x8xf32> -> vector<8x32xf32>
    %cst_26 = arith.constant dense<0.000000e+00> : vector<8x32xf32>
    %64 = tpu.matmul %63, %1, %cst_26 {dimension_numbers = #tpu.dot_dimension_numbers<[1], [0], [0], [1], [0, 0, 1, 1], [], []>} : vector<8x32xf32>, vector<32x32xf32>, vector<8x32xf32> -> vector<8x32xf32>
    %65 = arith.addf %11, %64 : vector<8x32xf32>
    %cst_27 = arith.constant dense<0.000000e+00> : vector<8xf32>
    %66 = vector.multi_reduction <add>, %65, %cst_27 [1] : vector<8x32xf32> to vector<8xf32>
    %67 = vector.shape_cast %66 : vector<8xf32> to vector<8x1xf32>
    %cst_28 = arith.constant 3.200000e+01 : f32
    %68 = vector.broadcast %cst_28 : f32 to vector<8x1xf32>
    %69 = arith.divf %67, %68 : vector<8x1xf32>
    %70 = arith.mulf %65, %65 : vector<8x32xf32>
    %cst_29 = arith.constant dense<0.000000e+00> : vector<8xf32>
    %71 = vector.multi_reduction <add>, %70, %cst_29 [1] : vector<8x32xf32> to vector<8xf32>
    %72 = vector.shape_cast %71 : vector<8xf32> to vector<8x1xf32>
    %cst_30 = arith.constant 3.200000e+01 : f32
    %73 = vector.broadcast %cst_30 : f32 to vector<8x1xf32>
    %74 = arith.divf %72, %73 : vector<8x1xf32>
    %75 = arith.mulf %69, %69 : vector<8x1xf32>
    %76 = arith.subf %74, %75 : vector<8x1xf32>
    %cst_31 = arith.constant 0.000000e+00 : f32
    %77 = vector.broadcast %cst_31 : f32 to vector<8x1xf32>
    %78 = arith.maximumf %76, %77 : vector<8x1xf32>
    %79 = vector.broadcast %69 : vector<8x1xf32> to vector<8x32xf32>
    %80 = arith.subf %65, %79 : vector<8x32xf32>
    %cst_32 = arith.constant 9.99999974E-6 : f32
    %81 = vector.broadcast %cst_32 : f32 to vector<8x1xf32>
    %82 = arith.addf %78, %81 : vector<8x1xf32>
    %83 = math.rsqrt %82 : vector<8x1xf32>
    %84 = vector.broadcast %83 : vector<8x1xf32> to vector<8x32xf32>
    %85 = arith.mulf %80, %84 : vector<8x32xf32>
    %86 = vector.broadcast %4 : vector<1x32xf32> to vector<8x32xf32>
    %87 = arith.mulf %85, %86 : vector<8x32xf32>
    %88 = vector.broadcast %5 : vector<1x32xf32> to vector<8x32xf32>
    %89 = arith.addf %87, %88 : vector<8x32xf32>
    %cst_33 = arith.constant dense<0.000000e+00> : vector<8x64xf32>
    %90 = tpu.matmul %89, %2, %cst_33 {dimension_numbers = #tpu.dot_dimension_numbers<[1], [0], [0], [1], [0, 0, 1, 1], [], []>} : vector<8x32xf32>, vector<32x64xf32>, vector<8x64xf32> -> vector<8x64xf32>
    %91 = vector.broadcast %8 : vector<1x64xf32> to vector<8x64xf32>
    %92 = arith.addf %90, %91 : vector<8x64xf32>
    %93 = arith.mulf %92, %92 : vector<8x64xf32>
    %94 = arith.mulf %92, %93 : vector<8x64xf32>
    %cst_34 = arith.constant 4.471500e-02 : f32
    %95 = vector.broadcast %cst_34 : f32 to vector<8x64xf32>
    %96 = arith.mulf %95, %94 : vector<8x64xf32>
    %97 = arith.addf %92, %96 : vector<8x64xf32>
    %cst_35 = arith.constant 0.797884583 : f32
    %98 = vector.broadcast %cst_35 : f32 to vector<8x64xf32>
    %99 = arith.mulf %98, %97 : vector<8x64xf32>
    %100 = math.tanh %99 : vector<8x64xf32>
    %cst_36 = arith.constant 1.000000e+00 : f32
    %101 = vector.broadcast %cst_36 : f32 to vector<8x64xf32>
    %102 = arith.addf %101, %100 : vector<8x64xf32>
    %cst_37 = arith.constant 5.000000e-01 : f32
    %103 = vector.broadcast %cst_37 : f32 to vector<8x64xf32>
    %104 = arith.mulf %103, %102 : vector<8x64xf32>
    %105 = arith.mulf %92, %104 : vector<8x64xf32>
    %cst_38 = arith.constant dense<0.000000e+00> : vector<8x32xf32>
    %106 = tpu.matmul %105, %3, %cst_38 {dimension_numbers = #tpu.dot_dimension_numbers<[1], [0], [0], [1], [0, 0, 1, 1], [], []>} : vector<8x64xf32>, vector<64x32xf32>, vector<8x32xf32> -> vector<8x32xf32>
    %107 = vector.broadcast %9 : vector<1x32xf32> to vector<8x32xf32>
    %108 = arith.addf %106, %107 : vector<8x32xf32>
    %109 = arith.addf %89, %108 : vector<8x32xf32>
    %cst_39 = arith.constant dense<0.000000e+00> : vector<8xf32>
    %110 = vector.multi_reduction <add>, %109, %cst_39 [1] : vector<8x32xf32> to vector<8xf32>
    %111 = vector.shape_cast %110 : vector<8xf32> to vector<8x1xf32>
    %cst_40 = arith.constant 3.200000e+01 : f32
    %112 = vector.broadcast %cst_40 : f32 to vector<8x1xf32>
    %113 = arith.divf %111, %112 : vector<8x1xf32>
    %114 = arith.mulf %109, %109 : vector<8x32xf32>
    %cst_41 = arith.constant dense<0.000000e+00> : vector<8xf32>
    %115 = vector.multi_reduction <add>, %114, %cst_41 [1] : vector<8x32xf32> to vector<8xf32>
    %116 = vector.shape_cast %115 : vector<8xf32> to vector<8x1xf32>
    %cst_42 = arith.constant 3.200000e+01 : f32
    %117 = vector.broadcast %cst_42 : f32 to vector<8x1xf32>
    %118 = arith.divf %116, %117 : vector<8x1xf32>
    %119 = arith.mulf %113, %113 : vector<8x1xf32>
    %120 = arith.subf %118, %119 : vector<8x1xf32>
    %cst_43 = arith.constant 0.000000e+00 : f32
    %121 = vector.broadcast %cst_43 : f32 to vector<8x1xf32>
    %122 = arith.maximumf %120, %121 : vector<8x1xf32>
    %123 = vector.broadcast %113 : vector<8x1xf32> to vector<8x32xf32>
    %124 = arith.subf %109, %123 : vector<8x32xf32>
    %cst_44 = arith.constant 9.99999974E-6 : f32
    %125 = vector.broadcast %cst_44 : f32 to vector<8x1xf32>
    %126 = arith.addf %122, %125 : vector<8x1xf32>
    %127 = math.rsqrt %126 : vector<8x1xf32>
    %128 = vector.broadcast %127 : vector<8x1xf32> to vector<8x32xf32>
    %129 = arith.mulf %124, %128 : vector<8x32xf32>
    %130 = vector.broadcast %6 : vector<1x32xf32> to vector<8x32xf32>
    %131 = arith.mulf %129, %130 : vector<8x32xf32>
    %132 = vector.broadcast %7 : vector<1x32xf32> to vector<8x32xf32>
    %133 = arith.addf %131, %132 : vector<8x32xf32>
    %c0_45 = arith.constant 0 : index
    %c0_46 = arith.constant 0 : index
    %c0_47 = arith.constant 0 : index
    %134 = vector.load %arg12[%c0_45, %c0_46, %c0_47] : memref<1x8x32xf32, #tpu.memory_space<vmem>>, vector<1x8x32xf32>
    %135 = vector.shape_cast %134 : vector<1x8x32xf32> to vector<8x32xf32>
    %136 = vector.shape_cast %133 : vector<8x32xf32> to vector<1x8x32xf32>
    tpu.vector_store %arg12[%c0_45, %c0_46, %c0_47], %136 {strides = array<i32>} : memref<1x8x32xf32, #tpu.memory_space<vmem>>, vector<1x8x32xf32>,
    return
  }
  func.func @transform_0(%arg0: i32) -> (i32, i32, i32) {
    %c0_i32 = arith.constant 0 : i32
    %c0_i32_0 = arith.constant 0 : i32
    %c0_i32_1 = arith.constant 0 : i32
    return %arg0, %c0_i32, %c0_i32_0 : i32, i32, i32
  }
  func.func @transform_1(%arg0: i32) -> (i32, i32) {
    %c0_i32 = arith.constant 0 : i32
    %c0_i32_0 = arith.constant 0 : i32
    %c0_i32_1 = arith.constant 0 : i32
    return %c0_i32, %c0_i32_0 : i32, i32
  }
  func.func @transform_2(%arg0: i32) -> (i32, i32) {
    %c0_i32 = arith.constant 0 : i32
    %c0_i32_0 = arith.constant 0 : i32
    %c0_i32_1 = arith.constant 0 : i32
    return %c0_i32, %c0_i32_0 : i32, i32
  }
  func.func @transform_3(%arg0: i32) -> (i32, i32) {
    %c0_i32 = arith.constant 0 : i32
    %c0_i32_0 = arith.constant 0 : i32
    %c0_i32_1 = arith.constant 0 : i32
    return %c0_i32, %c0_i32_0 : i32, i32
  }
  func.func @transform_4(%arg0: i32) -> (i32, i32) {
    %c0_i32 = arith.constant 0 : i32
    %c0_i32_0 = arith.constant 0 : i32
    %c0_i32_1 = arith.constant 0 : i32
    return %c0_i32, %c0_i32_0 : i32, i32
  }
  func.func @transform_5(%arg0: i32) -> (i32, i32) {
    %c0_i32 = arith.constant 0 : i32
    %c0_i32_0 = arith.constant 0 : i32
    %c0_i32_1 = arith.constant 0 : i32
    return %c0_i32, %c0_i32_0 : i32, i32
  }
  func.func @transform_6(%arg0: i32) -> (i32, i32) {
    %c0_i32 = arith.constant 0 : i32
    %c0_i32_0 = arith.constant 0 : i32
    %c0_i32_1 = arith.constant 0 : i32
    return %c0_i32, %c0_i32_0 : i32, i32
  }
  func.func @transform_7(%arg0: i32) -> (i32, i32) {
    %c0_i32 = arith.constant 0 : i32
    %c0_i32_0 = arith.constant 0 : i32
    %c0_i32_1 = arith.constant 0 : i32
    return %c0_i32, %c0_i32_0 : i32, i32
  }
  func.func @transform_8(%arg0: i32) -> (i32, i32) {
    %c0_i32 = arith.constant 0 : i32
    %c0_i32_0 = arith.constant 0 : i32
    %c0_i32_1 = arith.constant 0 : i32
    return %c0_i32, %c0_i32_0 : i32, i32
  }
  func.func @transform_9(%arg0: i32) -> (i32, i32) {
    %c0_i32 = arith.constant 0 : i32
    %c0_i32_0 = arith.constant 0 : i32
    %c0_i32_1 = arith.constant 0 : i32
    return %c0_i32, %c0_i32_0 : i32, i32
  }
  func.func @transform_10(%arg0: i32) -> (i32, i32) {
    %c0_i32 = arith.constant 0 : i32
    %c0_i32_0 = arith.constant 0 : i32
    %c0_i32_1 = arith.constant 0 : i32
    return %c0_i32, %c0_i32_0 : i32, i32
  }
  func.func @transform_11(%arg0: i32) -> (i32, i32, i32) {
    %c0_i32 = arith.constant 0 : i32
    %c0_i32_0 = arith.constant 0 : i32
    %c0_i32_1 = arith.constant 0 : i32
    return %arg0, %c0_i32, %c0_i32_0 : i32, i32, i32
  }
}

module attributes {stable_mosaic.version = 11 : i64} {
  func.func @encoder_block_kernel(%arg0: i32, %arg1: memref<1x8x32xf32, #tpu.memory_space<vmem>>, %arg2: memref<32x96xf32, #tpu.memory_space<vmem>>, %arg3: memref<32x32xf32, #tpu.memory_space<vmem>>, %arg4: memref<1x32xf32, #tpu.memory_space<vmem>>, %arg5: memref<1x32xf32, #tpu.memory_space<vmem>>, %arg6: memref<1x32xf32, #tpu.memory_space<vmem>>, %arg7: memref<1x32xf32, #tpu.memory_space<vmem>>, %arg8: memref<32x64xf32, #tpu.memory_space<vmem>>, %arg9: memref<1x64xf32, #tpu.memory_space<vmem>>, %arg10: memref<64x32xf32, #tpu.memory_space<vmem>>, %arg11: memref<1x32xf32, #tpu.memory_space<vmem>>, %arg12: memref<1x8x32xf32, #tpu.memory_space<vmem>>) attributes {dimension_semantics = [#tpu.dimension_semantics<parallel>], iteration_bounds = array<i64: 2>, scalar_prefetch = 0 : i64, scratch_operands = 0 : i64, tpu.core_type = #tpu.core_type<tc>, window_params = [{transform_indices = @transform_0, window_bounds = array<i64: 1, 8, 32>}, {pipeline_mode = #tpu.pipeline_mode<synchronous>, transform_indices = @transform_1, window_bounds = array<i64: 32, 96>}, {pipeline_mode = #tpu.pipeline_mode<synchronous>, transform_indices = @transform_2, window_bounds = array<i64: 32, 32>}, {pipeline_mode = #tpu.pipeline_mode<synchronous>, transform_indices = @transform_3, window_bounds = array<i64: 1, 32>}, {pipeline_mode = #tpu.pipeline_mode<synchronous>, transform_indices = @transform_4, window_bounds = array<i64: 1, 32>}, {pipeline_mode = #tpu.pipeline_mode<synchronous>, transform_indices = @transform_5, window_bounds = array<i64: 1, 32>}, {pipeline_mode = #tpu.pipeline_mode<synchronous>, transform_indices = @transform_6, window_bounds = array<i64: 1, 32>}, {pipeline_mode = #tpu.pipeline_mode<synchronous>, transform_indices = @transform_7, window_bounds = array<i64: 32, 64>}, {pipeline_mode = #tpu.pipeline_mode<synchronous>, transform_indices = @transform_8, window_bounds = array<i64: 1, 64>}, {pipeline_mode = #tpu.pipeline_mode<synchronous>, transform_indices = @transform_9, window_bounds = array<i64: 64, 32>}, {pipeline_mode = #tpu.pipeline_mode<synchronous>, transform_indices = @transform_10, window_bounds = array<i64: 1, 32>}, {transform_indices = @transform_11, window_bounds = array<i64: 1, 8, 32>}]} {
    %c0 = arith.constant 0 : index
    %c0_0 = arith.constant 0 : index
    %0 = vector.load %arg2[%c0, %c0_0] : memref<32x96xf32, #tpu.memory_space<vmem>>, vector<32x96xf32>
    %c0_1 = arith.constant 0 : index
    %c0_2 = arith.constant 0 : index
    %1 = vector.load %arg3[%c0_1, %c0_2] : memref<32x32xf32, #tpu.memory_space<vmem>>, vector<32x32xf32>
    %c0_3 = arith.constant 0 : index
    %c0_4 = arith.constant 0 : index
    %2 = vector.load %arg8[%c0_3, %c0_4] : memref<32x64xf32, #tpu.memory_space<vmem>>, vector<32x64xf32>
    %c0_5 = arith.constant 0 : index
    %c0_6 = arith.constant 0 : index
    %3 = vector.load %arg10[%c0_5, %c0_6] : memref<64x32xf32, #tpu.memory_space<vmem>>, vector<64x32xf32>
    %c0_7 = arith.constant 0 : index
    %c0_8 = arith.constant 0 : index
    %4 = vector.load %arg4[%c0_7, %c0_8] : memref<1x32xf32, #tpu.memory_space<vmem>>, vector<1x32xf32>
    %c0_9 = arith.constant 0 : index
    %c0_10 = arith.constant 0 : index
    %5 = vector.load %arg5[%c0_9, %c0_10] : memref<1x32xf32, #tpu.memory_space<vmem>>, vector<1x32xf32>
    %c0_11 = arith.constant 0 : index
    %c0_12 = arith.constant 0 : index
    %6 = vector.load %arg6[%c0_11, %c0_12] : memref<1x32xf32, #tpu.memory_space<vmem>>, vector<1x32xf32>
    %c0_13 = arith.constant 0 : index
    %c0_14 = arith.constant 0 : index
    %7 = vector.load %arg7[%c0_13, %c0_14] : memref<1x32xf32, #tpu.memory_space<vmem>>, vector<1x32xf32>
    %c0_15 = arith.constant 0 : index
    %c0_16 = arith.constant 0 : index
    %8 = vector.load %arg9[%c0_15, %c0_16] : memref<1x64xf32, #tpu.memory_space<vmem>>, vector<1x64xf32>
    %c0_17 = arith.constant 0 : index
    %c0_18 = arith.constant 0 : index
    %9 = vector.load %arg11[%c0_17, %c0_18] : memref<1x32xf32, #tpu.memory_space<vmem>>, vector<1x32xf32>
    %c0_19 = arith.constant 0 : index
    %c0_20 = arith.constant 0 : index
    %c0_21 = arith.constant 0 : index
    %10 = vector.load %arg1[%c0_19, %c0_20, %c0_21] : memref<1x8x32xf32, #tpu.memory_space<vmem>>, vector<1x8x32xf32>
    %11 = vector.shape_cast %10 : vector<1x8x32xf32> to vector<8x32xf32>
    %cst = arith.constant dense<0.000000e+00> : vector<8x96xf32>
    %12 = tpu.matmul %11, %0, %cst {dimension_numbers = #tpu.dot_dimension_numbers<[1], [0], [0], [1], [0, 0, 1, 1], [], []>} : vector<8x32xf32>, vector<32x96xf32>, vector<8x96xf32> -> vector<8x96xf32>
    %13 = vector.extract_strided_slice %12 {offsets = [0, 0], sizes = [8, 32], strides = [1, 1]} : vector<8x96xf32> to vector<8x32xf32>
    %14 = vector.extract_strided_slice %12 {offsets = [0, 32], sizes = [8, 32], strides = [1, 1]} : vector<8x96xf32> to vector<8x32xf32>
    %15 = vector.extract_strided_slice %12 {offsets = [0, 64], sizes = [8, 32], strides = [1, 1]} : vector<8x96xf32> to vector<8x32xf32>
    %16 = vector.extract_strided_slice %13 {offsets = [0, 0], sizes = [8, 8], strides = [1, 1]} : vector<8x32xf32> to vector<8x8xf32>
    %17 = vector.extract_strided_slice %13 {offsets = [0, 8], sizes = [8, 8], strides = [1, 1]} : vector<8x32xf32> to vector<8x8xf32>
    %18 = vector.extract_strided_slice %13 {offsets = [0, 16], sizes = [8, 8], strides = [1, 1]} : vector<8x32xf32> to vector<8x8xf32>
    %19 = vector.extract_strided_slice %13 {offsets = [0, 24], sizes = [8, 8], strides = [1, 1]} : vector<8x32xf32> to vector<8x8xf32>
    %20 = vector.shape_cast %16 : vector<8x8xf32> to vector<1x8x8xf32>
    %21 = vector.shape_cast %17 : vector<8x8xf32> to vector<1x8x8xf32>
    %22 = vector.shape_cast %18 : vector<8x8xf32> to vector<1x8x8xf32>
    %23 = vector.shape_cast %19 : vector<8x8xf32> to vector<1x8x8xf32>
    %24 = tpu.concatenate %20, %21, %22, %23 in 0 : vector<1x8x8xf32>, vector<1x8x8xf32>, vector<1x8x8xf32>, vector<1x8x8xf32> -> vector<4x8x8xf32>
    %25 = vector.extract_strided_slice %14 {offsets = [0, 0], sizes = [8, 8], strides = [1, 1]} : vector<8x32xf32> to vector<8x8xf32>
    %26 = vector.extract_strided_slice %14 {offsets = [0, 8], sizes = [8, 8], strides = [1, 1]} : vector<8x32xf32> to vector<8x8xf32>
    %27 = vector.extract_strided_slice %14 {offsets = [0, 16], sizes = [8, 8], strides = [1, 1]} : vector<8x32xf32> to vector<8x8xf32>
    %28 = vector.extract_strided_slice %14 {offsets = [0, 24], sizes = [8, 8], strides = [1, 1]} : vector<8x32xf32> to vector<8x8xf32>
    %29 = vector.shape_cast %25 : vector<8x8xf32> to vector<1x8x8xf32>
    %30 = vector.shape_cast %26 : vector<8x8xf32> to vector<1x8x8xf32>
    %31 = vector.shape_cast %27 : vector<8x8xf32> to vector<1x8x8xf32>
    %32 = vector.shape_cast %28 : vector<8x8xf32> to vector<1x8x8xf32>
    %33 = tpu.concatenate %29, %30, %31, %32 in 0 : vector<1x8x8xf32>, vector<1x8x8xf32>, vector<1x8x8xf32>, vector<1x8x8xf32> -> vector<4x8x8xf32>
    %34 = vector.extract_strided_slice %15 {offsets = [0, 0], sizes = [8, 8], strides = [1, 1]} : vector<8x32xf32> to vector<8x8xf32>
    %35 = vector.extract_strided_slice %15 {offsets = [0, 8], sizes = [8, 8], strides = [1, 1]} : vector<8x32xf32> to vector<8x8xf32>
    %36 = vector.extract_strided_slice %15 {offsets = [0, 16], sizes = [8, 8], strides = [1, 1]} : vector<8x32xf32> to vector<8x8xf32>
    %37 = vector.extract_strided_slice %15 {offsets = [0, 24], sizes = [8, 8], strides = [1, 1]} : vector<8x32xf32> to vector<8x8xf32>
    %38 = vector.shape_cast %34 : vector<8x8xf32> to vector<1x8x8xf32>
    %39 = vector.shape_cast %35 : vector<8x8xf32> to vector<1x8x8xf32>
    %40 = vector.shape_cast %36 : vector<8x8xf32> to vector<1x8x8xf32>
    %41 = vector.shape_cast %37 : vector<8x8xf32> to vector<1x8x8xf32>
    %42 = tpu.concatenate %38, %39, %40, %41 in 0 : vector<1x8x8xf32>, vector<1x8x8xf32>, vector<1x8x8xf32>, vector<1x8x8xf32> -> vector<4x8x8xf32>
    "tpu.trace_start"() <{level = 10 : i32, message = "htd,hsd->hts"}> : () -> ()
    %cst_22 = arith.constant dense<0.000000e+00> : vector<4x8x8xf32>
    %43 = tpu.matmul %24, %33, %cst_22 {dimension_numbers = #tpu.dot_dimension_numbers<[2], [2], [1], [1], [0, 0, 0, 1, 1, 1], [0], [0]>} : vector<4x8x8xf32>, vector<4x8x8xf32>, vector<4x8x8xf32> -> vector<4x8x8xf32>
    "tpu.trace_stop"() : () -> ()
    %cst_23 = arith.constant dense<0xFF800000> : vector<4x8xf32>
    %44 = vector.multi_reduction <maximumf>, %43, %cst_23 [2] : vector<4x8x8xf32> to vector<4x8xf32>
    %45 = vector.shape_cast %44 : vector<4x8xf32> to vector<4x8x1xf32>
    %46 = vector.broadcast %45 : vector<4x8x1xf32> to vector<4x8x8xf32>
    %47 = arith.subf %43, %46 : vector<4x8x8xf32>
    %48 = math.exp %47 : vector<4x8x8xf32>
    %cst_24 = arith.constant dense<0.000000e+00> : vector<4x8xf32>
    %49 = vector.multi_reduction <add>, %48, %cst_24 [2] : vector<4x8x8xf32> to vector<4x8xf32>
    %50 = vector.shape_cast %49 : vector<4x8xf32> to vector<4x8x1xf32>
    %51 = tpu.reciprocal %50 : vector<4x8x1xf32> -> vector<4x8x1xf32>
    %52 = vector.broadcast %51 : vector<4x8x1xf32> to vector<4x8x8xf32>
    %53 = arith.mulf %48, %52 : vector<4x8x8xf32>
    "tpu.trace_start"() <{level = 10 : i32, message = "hts,hsd->htd"}> : () -> ()
    %cst_25 = arith.constant dense<0.000000e+00> : vector<4x8x8xf32>
    %54 = tpu.matmul %53, %42, %cst_25 {dimension_numbers = #tpu.dot_dimension_numbers<[2], [1], [1], [2], [0, 0, 0, 1, 1, 2], [0], [0]>} : vector<4x8x8xf32>, vector<4x8x8xf32>, vector<4x8x8xf32> -> vector<4x8x8xf32>
    "tpu.trace_stop"() : () -> ()
    %55 = vector.extract_strided_slice %54 {offsets = [0, 0, 0], sizes = [1, 8, 8], strides = [1, 1, 1]} : vector<4x8x8xf32> to vector<1x8x8xf32>
    %56 = vector.shape_cast %55 : vector<1x8x8xf32> to vector<8x8xf32>
    %57 = vector.extract_strided_slice %54 {offsets = [1, 0, 0], sizes = [1, 8, 8], strides = [1, 1, 1]} : vector<4x8x8xf32> to vector<1x8x8xf32>
    %58 = vector.shape_cast %57 : vector<1x8x8xf32> to vector<8x8xf32>
    %59 = vector.extract_strided_slice %54 {offsets = [2, 0, 0], sizes = [1, 8, 8], strides = [1, 1, 1]} : vector<4x8x8xf32> to vector<1x8x8xf32>
    %60 = vector.shape_cast %59 : vector<1x8x8xf32> to vector<8x8xf32>
    %61 = vector.extract_strided_slice %54 {offsets = [3, 0, 0], sizes = [1, 8, 8], strides = [1, 1, 1]} : vector<4x8x8xf32> to vector<1x8x8xf32>
    %62 = vector.shape_cast %61 : vector<1x8x8xf32> to vector<8x8xf32>
    %63 = tpu.concatenate %56, %58, %60, %62 in 1 : vector<8x8xf32>, vector<8x8xf32>, vector<8x8xf32>, vector<8x8xf32> -> vector<8x32xf32>
    %cst_26 = arith.constant dense<0.000000e+00> : vector<8x32xf32>
    %64 = tpu.matmul %63, %1, %cst_26 {dimension_numbers = #tpu.dot_dimension_numbers<[1], [0], [0], [1], [0, 0, 1, 1], [], []>} : vector<8x32xf32>, vector<32x32xf32>, vector<8x32xf32> -> vector<8x32xf32>
    %65 = arith.addf %11, %64 : vector<8x32xf32>
    %cst_27 = arith.constant dense<0.000000e+00> : vector<8xf32>
    %66 = vector.multi_reduction <add>, %65, %cst_27 [1] : vector<8x32xf32> to vector<8xf32>
    %67 = vector.shape_cast %66 : vector<8xf32> to vector<8x1xf32>
    %cst_28 = arith.constant 3.200000e+01 : f32
    %68 = vector.broadcast %cst_28 : f32 to vector<8x1xf32>
    %69 = arith.divf %67, %68 : vector<8x1xf32>
    %70 = arith.mulf %65, %65 : vector<8x32xf32>
    %cst_29 = arith.constant dense<0.000000e+00> : vector<8xf32>
    %71 = vector.multi_reduction <add>, %70, %cst_29 [1] : vector<8x32xf32> to vector<8xf32>
    %72 = vector.shape_cast %71 : vector<8xf32> to vector<8x1xf32>
    %cst_30 = arith.constant 3.200000e+01 : f32
    %73 = vector.broadcast %cst_30 : f32 to vector<8x1xf32>
    %74 = arith.divf %72, %73 : vector<8x1xf32>
    %75 = arith.mulf %69, %69 : vector<8x1xf32>
    %76 = arith.subf %74, %75 : vector<8x1xf32>
    %cst_31 = arith.constant 0.000000e+00 : f32
    %77 = vector.broadcast %cst_31 : f32 to vector<8x1xf32>
    %78 = arith.maximumf %76, %77 : vector<8x1xf32>
    %79 = vector.broadcast %69 : vector<8x1xf32> to vector<8x32xf32>
    %80 = arith.subf %65, %79 : vector<8x32xf32>
    %cst_32 = arith.constant 9.99999974E-6 : f32
    %81 = vector.broadcast %cst_32 : f32 to vector<8x1xf32>
    %82 = arith.addf %78, %81 : vector<8x1xf32>
    %83 = math.rsqrt %82 : vector<8x1xf32>
    %84 = vector.broadcast %83 : vector<8x1xf32> to vector<8x32xf32>
    %85 = arith.mulf %80, %84 : vector<8x32xf32>
    %86 = vector.broadcast %4 : vector<1x32xf32> to vector<8x32xf32>
    %87 = arith.mulf %85, %86 : vector<8x32xf32>
    %88 = vector.broadcast %5 : vector<1x32xf32> to vector<8x32xf32>
    %89 = arith.addf %87, %88 : vector<8x32xf32>
    %cst_33 = arith.constant dense<0.000000e+00> : vector<8x64xf32>
    %90 = tpu.matmul %89, %2, %cst_33 {dimension_numbers = #tpu.dot_dimension_numbers<[1], [0], [0], [1], [0, 0, 1, 1], [], []>} : vector<8x32xf32>, vector<32x64xf32>, vector<8x64xf32> -> vector<8x64xf32>
    %91 = vector.broadcast %8 : vector<1x64xf32> to vector<8x64xf32>
    %92 = arith.addf %90, %91 : vector<8x64xf32>
    %93 = arith.mulf %92, %92 : vector<8x64xf32>
    %94 = arith.mulf %92, %93 : vector<8x64xf32>
    %cst_34 = arith.constant 4.471500e-02 : f32
    %95 = vector.broadcast %cst_34 : f32 to vector<8x64xf32>
    %96 = arith.mulf %95, %94 : vector<8x64xf32>
    %97 = arith.addf %92, %96 : vector<8x64xf32>
    %cst_35 = arith.constant 0.797884583 : f32
    %98 = vector.broadcast %cst_35 : f32 to vector<8x64xf32>
    %99 = arith.mulf %98, %97 : vector<8x64xf32>
    %100 = math.tanh %99 : vector<8x64xf32>
    %cst_36 = arith.constant 1.000000e+00 : f32
    %101 = vector.broadcast %cst_36 : f32 to vector<8x64xf32>
    %102 = arith.addf %101, %100 : vector<8x64xf32>
    %cst_37 = arith.constant 5.000000e-01 : f32
    %103 = vector.broadcast %cst_37 : f32 to vector<8x64xf32>
    %104 = arith.mulf %103, %102 : vector<8x64xf32>
    %105 = arith.mulf %92, %104 : vector<8x64xf32>
    %cst_38 = arith.constant dense<0.000000e+00> : vector<8x32xf32>
    %106 = tpu.matmul %105, %3, %cst_38 {dimension_numbers = #tpu.dot_dimension_numbers<[1], [0], [0], [1], [0, 0, 1, 1], [], []>} : vector<8x64xf32>, vector<64x32xf32>, vector<8x32xf32> -> vector<8x32xf32>
    %107 = vector.broadcast %9 : vector<1x32xf32> to vector<8x32xf32>
    %108 = arith.addf %106, %107 : vector<8x32xf32>
    %109 = arith.addf %89, %108 : vector<8x32xf32>
    %cst_39 = arith.constant dense<0.000000e+00> : vector<8xf32>
    %110 = vector.multi_reduction <add>, %109, %cst_39 [1] : vector<8x32xf32> to vector<8xf32>
    %111 = vector.shape_cast %110 : vector<8xf32> to vector<8x1xf32>
    %cst_40 = arith.constant 3.200000e+01 : f32
    %112 = vector.broadcast %cst_40 : f32 to vector<8x1xf32>
    %113 = arith.divf %111, %112 : vector<8x1xf32>
    %114 = arith.mulf %109, %109 : vector<8x32xf32>
    %cst_41 = arith.constant dense<0.000000e+00> : vector<8xf32>
    %115 = vector.multi_reduction <add>, %114, %cst_41 [1] : vector<8x32xf32> to vector<8xf32>
    %116 = vector.shape_cast %115 : vector<8xf32> to vector<8x1xf32>
    %cst_42 = arith.constant 3.200000e+01 : f32
    %117 = vector.broadcast %cst_42 : f32 to vector<8x1xf32>
    %118 = arith.divf %116, %117 : vector<8x1xf32>
    %119 = arith.mulf %113, %113 : vector<8x1xf32>
    %120 = arith.subf %118, %119 : vector<8x1xf32>
    %cst_43 = arith.constant 0.000000e+00 : f32
    %121 = vector.broadcast %cst_43 : f32 to vector<8x1xf32>
    %122 = arith.maximumf %120, %121 : vector<8x1xf32>
    %123 = vector.broadcast %113 : vector<8x1xf32> to vector<8x32xf32>
    %124 = arith.subf %109, %123 : vector<8x32xf32>
    %cst_44 = arith.constant 9.99999974E-6 : f32
    %125 = vector.broadcast %cst_44 : f32 to vector<8x1xf32>
    %126 = arith.addf %122, %125 : vector<8x1xf32>
    %127 = math.rsqrt %126 : vector<8x1xf32>
    %128 = vector.broadcast %127 : vector<8x1xf32> to vector<8x32xf32>
    %129 = arith.mulf %124, %128 : vector<8x32xf32>
    %130 = vector.broadcast %6 : vector<1x32xf32> to vector<8x32xf32>
    %131 = arith.mulf %129, %130 : vector<8x32xf32>
    %132 = vector.broadcast %7 : vector<1x32xf32> to vector<8x32xf32>
    %133 = arith.addf %131, %132 : vector<8x32xf32>
    %c0_45 = arith.constant 0 : index
    %c0_46 = arith.constant 0 : index
    %c0_47 = arith.constant 0 : index
    %134 = vector.load %arg12[%c0_45, %c0_46, %c0_47] : memref<1x8x32xf32, #tpu.memory_space<vmem>>, vector<1x8x32xf32>
    %135 = vector.shape_cast %134 : vector<1x8x32xf32> to vector<8x32xf32>
    %136 = vector.shape_cast %133 : vector<8x32xf32> to vector<1x8x32xf32>
    tpu.vector_store %arg12[%c0_45, %c0_46, %c0_47], %136 {strides = array<i32>} : memref<1x8x32xf32, #tpu.memory_space<vmem>>, vector<1x8x32xf32>,
    return
  }
  func.func @transform_0(%arg0: i32) -> (i32, i32, i32) {
    %c0_i32 = arith.constant 0 : i32
    %c0_i32_0 = arith.constant 0 : i32
    %c0_i32_1 = arith.constant 0 : i32
    return %arg0, %c0_i32, %c0_i32_0 : i32, i32, i32
  }
  func.func @transform_1(%arg0: i32) -> (i32, i32) {
    %c0_i32 = arith.constant 0 : i32
    %c0_i32_0 = arith.constant 0 : i32
    %c0_i32_1 = arith.constant 0 : i32
    return %c0_i32, %c0_i32_0 : i32, i32
  }
  func.func @transform_2(%arg0: i32) -> (i32, i32) {
    %c0_i32 = arith.constant 0 : i32
    %c0_i32_0 = arith.constant 0 : i32
    %c0_i32_1 = arith.constant 0 : i32
    return %c0_i32, %c0_i32_0 : i32, i32
  }
  func.func @transform_3(%arg0: i32) -> (i32, i32) {
    %c0_i32 = arith.constant 0 : i32
    %c0_i32_0 = arith.constant 0 : i32
    %c0_i32_1 = arith.constant 0 : i32
    return %c0_i32, %c0_i32_0 : i32, i32
  }
  func.func @transform_4(%arg0: i32) -> (i32, i32) {
    %c0_i32 = arith.constant 0 : i32
    %c0_i32_0 = arith.constant 0 : i32
    %c0_i32_1 = arith.constant 0 : i32
    return %c0_i32, %c0_i32_0 : i32, i32
  }
  func.func @transform_5(%arg0: i32) -> (i32, i32) {
    %c0_i32 = arith.constant 0 : i32
    %c0_i32_0 = arith.constant 0 : i32
    %c0_i32_1 = arith.constant 0 : i32
    return %c0_i32, %c0_i32_0 : i32, i32
  }
  func.func @transform_6(%arg0: i32) -> (i32, i32) {
    %c0_i32 = arith.constant 0 : i32
    %c0_i32_0 = arith.constant 0 : i32
    %c0_i32_1 = arith.constant 0 : i32
    return %c0_i32, %c0_i32_0 : i32, i32
  }
  func.func @transform_7(%arg0: i32) -> (i32, i32) {
    %c0_i32 = arith.constant 0 : i32
    %c0_i32_0 = arith.constant 0 : i32
    %c0_i32_1 = arith.constant 0 : i32
    return %c0_i32, %c0_i32_0 : i32, i32
  }
  func.func @transform_8(%arg0: i32) -> (i32, i32) {
    %c0_i32 = arith.constant 0 : i32
    %c0_i32_0 = arith.constant 0 : i32
    %c0_i32_1 = arith.constant 0 : i32
    return %c0_i32, %c0_i32_0 : i32, i32
  }
  func.func @transform_9(%arg0: i32) -> (i32, i32) {
    %c0_i32 = arith.constant 0 : i32
    %c0_i32_0 = arith.constant 0 : i32
    %c0_i32_1 = arith.constant 0 : i32
    return %c0_i32, %c0_i32_0 : i32, i32
  }
  func.func @transform_10(%arg0: i32) -> (i32, i32) {
    %c0_i32 = arith.constant 0 : i32
    %c0_i32_0 = arith.constant 0 : i32
    %c0_i32_1 = arith.constant 0 : i32
    return %c0_i32, %c0_i32_0 : i32, i32
  }
  func.func @transform_11(%arg0: i32) -> (i32, i32, i32) {
    %c0_i32 = arith.constant 0 : i32
    %c0_i32_0 = arith.constant 0 : i32
    %c0_i32_1 = arith.constant 0 : i32
    return %arg0, %c0_i32, %c0_i32_0 : i32, i32, i32
  }
}

</mosaic_0001>

<bundles_post_ra>
// kernel: tpu_custom_call.1
= control target key start
LH: loop header
LB: loop body
LE: loop exit
PB: predicated region body
PF: predicated region fallthrough
CT: control target
= control target key end

     0   :  { %16 = vsyncpa [#allocation3], 0  ;;  %s1609_s0 = inlined_call_operand.hbm [shape: f32[2,8,32], index: 0, kind: input, shape index: {}]   ;;  %s1610_s1 = inlined_call_operand.vmem [shape: f32[32,96], index: 1, kind: input, shape index: {}]   ;;  %s1611_s2 = inlined_call_operand.vmem [shape: f32[32,32], index: 2, kind: input, shape index: {}]   ;;  %s1612_s3 = inlined_call_operand.vmem [shape: f32[1,32], index: 3, kind: input, shape index: {}]   ;;  %s1613_s4 = inlined_call_operand.vmem [shape: f32[1,32], index: 4, kind: input, shape index: {}]   ;;  %s1614_s5 = inlined_call_operand.vmem [shape: f32[1,32], index: 5, kind: input, shape index: {}]   ;;  %s1615_s6 = inlined_call_operand.vmem [shape: f32[1,32], index: 6, kind: input, shape index: {}]   ;;  %s1616_s7 = inlined_call_operand.vmem [shape: f32[32,64], index: 7, kind: input, shape index: {}]   ;;  %s1617_s8 = inlined_call_operand.vmem [shape: f32[1,64], index: 8, kind: input, shape index: {}]   ;;  %s1618_s9 = inlined_call_operand.vmem [shape: f32[64,32], index: 9, kind: input, shape index: {}]   ;;  %s1619_s10 = inlined_call_operand.vmem [shape: f32[1,32], index: 10, kind: input, shape index: {}]   ;;  %s1620_s11 = inlined_call_operand.hbm [shape: f32[2,8,32], index: 11, kind: output, shape index: {}]  }
   0x1   :  { %18 = vsyncpa [#allocation3 + $0x1], 0 }
   0x2   :  { %19 = vsyncpa [#allocation4], 0 }
   0x3   :  { %21 = vsyncpa [#allocation4 + $0x1], 0  ;;  %s1316_s17 = smov 0   ;;  %s1318_s18 = smov 0  }
   0x4   :  { %s1320_s19 = smov 0   ;;  %s1322_s20 = smov 0  }
   0x5 LB: > { %1626 = sst [smem:[#allocation8_spill]] %s1233_s17  ;;  %s1337_s21 = sadd.s32 4294967295, %s1245_s20   ;;  %s1245_s20 = sphi %s1322_s20, %s1641_s20   ;;  %s1241_s19 = sphi %s1320_s19, %s1643_s19   ;;  %s1237_s18 = sphi %s1318_s18, %s1645_s18   ;;  %s1233_s17 = sphi %s1316_s17, %s1644_s17  }
   0x6   : > { %1627 = sst [smem:[#allocation9_spill]] %s1241_s19  ;;  %s1031_s22 = sadd.s32 4294967294, %s1245_s20  }
   0x7   : > { %s1341_s23 = sadd.s32 1, %s1245_s20   ;;  %s34_s24 = sadd.s32 1, %s1241_s19 }
   0x8   : > { %1628 = sst [smem:[#allocation10_spill]] %s1341_s23  ;;  %s31_s25 = ssub.s32 %s1245_s20, %s1341_s23 }
   0x9   : > { %p41_p0 = scmp.ne.s32.totalorder %s1241_s19, %s1237_s18  ;;  %p32_p1 = scmp.eq.s32.totalorder %s31_s25, 0 }
   0xa   : > { %p42_p2 = scmp.eq.s32.totalorder %s1245_s20, 0  ;;  %p47_p3 = scmp.ne.s32.totalorder %s1237_s18, %s1233_s17 }
   0xb   : > { %p48_p4 = scmp.eq.s32.totalorder %s1337_s21, 0  ;;  %p281_p7 = scmp.eq.s32.totalorder %s1337_s21, 1 }
   0xc   : > { %s1353_s26 = scalar_select %p32_p1, %s1241_s19, %s34_s24  }
   0xd   : > { %p1355_p5 = por %p42_p2, %p41_p0  ;;  %p1359_p6 = por %p48_p4, %p47_p3 }
   0xe   : > { %1629 = sst [smem:[#allocation11_spill]] %s1353_s26  ;;  %p287_p8 = scmp.eq.s32.totalorder %s1031_s22, 1 }
   0xf   : > { %p1071_p10 = scmp.lt.s32.totalorder %s1245_s20, 2  ;;  %p1366_p11 = por %p281_p7, %p41_p0 }
  0x10   : > { %p1370_p12 = por %p287_p8, %p47_p3  ;;  %s337_s12 = sand.u32 1, %s1241_s19  }
  0x11   : > { %s1035_s13 = sshll.u32 %s1245_s20, 3  ;;  %s1034_s14 = sshll.u32 %s337_s12, 3 }
  0x12   : > { %s1633_s30 = scalar_select %p1370_p12, 1, 0 }
  0x13   : > { %s345_s24 = scalar_lea.hbm %s1609_s0, %s1035_s13  ;;  %s341_s22 = scalar_lea.vmem [#allocation2], %s1034_s14 }
  0x14   : > { %1634 = sst [smem:[#allocation12_spill]] %s1633_s30  ;;  %s347_s25 = sshll.u32 %s345_s24, 4  ;;  %s348_s25 = int_to_ptr.hbm [resolvable:$true] %s347_s25 }
  0x15   : > { %s349_s26 = sshll.u32 %s341_s22, 4  ;;  %p1381_p13 = pnand %p1071_p10, %p1355_p5  ;;  %s350_s26 = int_to_ptr.vmem [resolvable:$true] %s349_s26 }
  0x16   : > { %p1036_p0 = scmp.ge.s32.totalorder %s1245_s20, 1  ;;  %p354_p1 = scmp.lt.s32.totalorder %s1245_s20, 3 }
  0x17   : > { %s338_s19 = scalar_lea.sflag [#allocation3], %s337_s12  ;;  %s1149_s30 = sshra.s32 %s348_s25, 4  ;;  %s1150_s30 = int_to_ptr.hbm [resolvable:$true] %s1149_s30 }
  0x18   : > { %s1151_s17 = scalar_lea.hbm %s1150_s30, 8  ;;  %p1153_p3 = pneg %p1381_p13 }
  0x19   : > { %p1152_p2 = scmp.ne.s32.totalorder %s1150_s30, %s1151_s17  ;;  %s1156_s27 = scalar_lea.hbm %s1609_s0, 16 }
  0x1a   : > { %p1157_p5 = scmp.lt.s32.totalorder %s1150_s30, %s1609_s0  ;;  %p1158_p8 = scmp.lt.s32.totalorder %s1156_s27, %s1151_s17 }
  0x1b   : > { %p1154_p4 = pnand %p1153_p3, %p1152_p2 }
  0x1c   : > { %p1159_p10 = por %p1158_p8, %p1157_p5 }
  0x1d   : > { %p1155_p7 = pneg %p1154_p4 }
  0x1f   : > { %p1160_p9 = pnand %p1159_p10, %p1155_p7 }
  0x21   : > { %1163 = shalt.err (!%p1160_p9)
}
  0x22   : > { %1066 = dma.hbm_to_vmem [thread:$0]  (!%p1381_p13), %s348_s25, 128, %s350_s26, %s338_s19  }
  0x23   : > { %p355_p2 = pnand %p1036_p0, %p354_p1 }
  0x24   : > { %s1402_s12 = sand.u32 (!%p355_p2), 1, %s1237_s18  }
  0x25   : > { %358 = sbr.rel (%p355_p2) target bundleno = 1796 (0x704), region = 64  ;;  %s1037_s17 = sshll.u32 (!%p355_p2), %s1402_s12, 3 }
  0x26   : > { %s361_s30 = scalar_lea.sflag (!%p355_p2), [#allocation3], %s1402_s12  ;;  %s364_s24 = scalar_lea.vmem (!%p355_p2), [#allocation2], %s1037_s17 }
  0x2a   : > { %1224 = dma.done.wait (%p1359_p6), %s361_s30, 128  }
  0x2b   : > { %1226 = vsyncadd (%p1359_p6), %s361_s30, 4294967168  ;;  %v407_v0 = vld [vmem:[%s1610_s1 + $0x18] sm:$0xff]  ;;  %v406_v1 = vld [vmem:[%s1610_s1 + $0x10] sm:$0xff]  ;;  %vm431_vm0 = vcmask 261120   ;;  %s1247_s28 = smov 104   ;;  %s1248_s15 = smov 120  }
  0x2c   : > { %447 = vmatpush.msra.mxu0 %v407_v0  ;;  %v405_v2 = vld [vmem:[%s1610_s1 + $0x8] sm:$0xff]  ;;  %v404_v3 = vld [vmem:[%s1610_s1] sm:$0xff]  ;;  %s1249_s16 = smov 112   ;;  %s1250_s30 = smov 96   ;;  %vm464_vm1 = vcmask 64512  }
  0x2d   : > { %v1424_v4 = vld [vmem:[%s364_s24] sm:$0xff]  ;;  %s1251_s24 = smov 64   ;;  %s1252_s19 = smov 16  }
  0x2e   : > { %448 = vmatpush.msra.mxu0 %v406_v1  ;;  %s1253_s23 = smov 8   ;;  %s1254_s26 = smov 24  }
  0x2f   : > { %s1056_s22 = sshll.u32 %s1337_s21, 3  ;;  %s403_s21 = scalar_lea.vmem [#allocation5], %s1037_s17 }
  0x30   : > { %449 = vmatpush.msra.mxu0 %v405_v2  ;;  %s1199_s17 = scalar_lea.hbm %s1620_s11, 16 }
  0x32   : > { %450 = vmatpush.msra.mxu0 %v404_v3 }
  0x33   : > { %1039 = vmatmul.msk.f32.vlgmr.msra.gmra.mxu0 %vm431_vm0, %v1424_v4 }
  0xb0   : > { %v1428_v5 = vpop.f32.mrf.mxu0 }
  0xb1   : > { %460 = vrot.lane.b32.xlu1 %v1428_v5, %s1247_s28  ;;  %456 = vrot.lane.b32.xlu0 %v1428_v5, %s1248_s15  ;;  %s956_s15 = scalar_lea.hbm %s1620_s11, %s1056_s22 }
  0xb9   : > { %458 = vrot.lane.b32.xlu0 %v1428_v5, %s1249_s16 }
 0x123   : > { %v461_v6 = vpop.permute.xlu1 %460  ;;  %v1433_v7 = vpop.permute.xlu0 %456 }
 0x124   : > { %541 = vrot.lane.b32.xlu0 %v461_v6, %s1250_s30  ;;  %489 = vrot.lane.b32.xlu1 %v1433_v7, %s1250_s30 }
 0x12b   : > { %v459_v8 = vpop.permute.xlu0 %458 }
 0x12c   : > { %515 = vrot.lane.b32.xlu2 %v459_v8, %s1250_s30  ;;  %v1114_v41 = vpack.i.bf16 %v459_v8, %v1433_v7 }
 0x134   : > { %462 = vrot.lane.b32.xlu2 %v1428_v5, %s1250_s30 }
 0x186   : > { %v516_v9 = vpop.permute.xlu2 %515 }
 0x187   : > { %1044 = vmatpush.xpose.msk.msra.mxu3 %vm464_vm1, %v516_v9 }
 0x18a   : > { %1045 = vmatmul.msk.f32.vlgmr.msra.gmra.mxu3 %vm464_vm1, %v459_v8 }
 0x18e   : > { %v463_v10 = vpop.permute.xlu2 %462 }
 0x18f   : > { %1040 = vmatpush.xpose.msk.msra.mxu1 %vm464_vm1, %v463_v10 }
 0x192   : > { %1041 = vmatmul.msk.f32.vlgmr.msra.gmra.mxu1 %vm464_vm1, %v1428_v5 }
 0x196   : > { %v490_v11 = vpop.permute.xlu1 %489  ;;  %v542_v12 = vpop.permute.xlu0 %541 }
 0x197   : > { %1042 = vmatpush.xpose.msk.msra.mxu2 %vm464_vm1, %v490_v11  ;;  %1046 = vmatpush.xpose.msk.msrb.mxu1 %vm464_vm1, %v542_v12 }
 0x19a   : > { %1043 = vmatmul.msk.f32.vlgmr.msra.gmra.mxu2 %vm464_vm1, %v1433_v7  ;;  %1047 = vmatmul.msk.f32.vlgmr.msrb.gmra.mxu1 %vm464_vm1, %v461_v6 }
 0x20d   : > { %v538_v13 = vpop.f32.mrf.mxu3 }
 0x20e   : > { %v573_v14 = vsel %vm464_vm1, %v538_v13, -inf }
 0x20f   : > { %574 = vmax.xlane.f32.xlu2 %v573_v14  ;;  %v486_v15 = vpop.f32.mrf.mxu1 }
 0x210   : > { %v567_v16 = vsel %vm464_vm1, %v486_v15, -inf }
 0x217   : > { %568 = vmax.xlane.f32.xlu2 %v567_v16  ;;  %v564_v17 = vpop.f32.mrf.mxu1 }
 0x218   : > { %v576_v18 = vsel %vm464_vm1, %v564_v17, -inf }
 0x219   : > { %577 = vmax.xlane.f32.xlu0 %v576_v18 }
 0x21d   : > { %v512_v19 = vpop.f32.mrf.mxu2 }
 0x21e   : > { %v570_v20 = vsel %vm464_vm1, %v512_v19, -inf }
 0x21f   : > { %571 = vmax.xlane.f32.xlu1 %v570_v20 }
 0x282   : > { %v575_v21 = vpop.xlane.xlu2 %574 }
 0x283   : > { %v581_v22 = vsub.f32 %v538_v13, %v575_v21 }
 0x285   : > { %v587_v23 = vmul.f32 1.442695, %v581_v22 }
 0x287   : > { %1125 = vpow2.f32 %v587_v23 }
 0x28a   : > { %v569_v24 = vpop.xlane.xlu2 %568 }
 0x28b   : > { %v579_v28 = vsub.f32 %v486_v15, %v569_v24 }
 0x28c   : > { %v578_v25 = vpop.xlane.xlu0 %577 }
 0x28d   : > { %v1451_v26 = vpop.eup %1125  ;;  %v582_v27 = vsub.f32 %v564_v17, %v578_v25  ;;  %v583_v31 = vmul.f32 1.442695, %v579_v28 }
 0x28e   : > { %v597_v29 = vsel %vm464_vm1, %v1451_v26, 0.0 }
 0x28f   : > { %v589_v30 = vmul.f32 1.442695, %v582_v27  ;;  %598 = vadd.xlane.f32.xlu2 %v597_v29 }
 0x291   : > { %1127 = vpow2.f32 %v589_v30 }
 0x292   : > { %v572_v32 = vpop.xlane.xlu1 %571  ;;  %1129 = vpow2.f32 %v583_v31 }
 0x293   : > { %v580_v33 = vsub.f32 %v512_v19, %v572_v32 }
 0x295   : > { %v585_v34 = vmul.f32 1.442695, %v580_v33 }
 0x297   : > { %v1455_v35 = vpop.eup %1127  ;;  %1131 = vpow2.f32 %v585_v34 }
 0x298   : > { %v600_v36 = vsel %vm464_vm1, %v1455_v35, 0.0  ;;  %v1130_v37 = vpop.eup %1129 }
 0x299   : > { %601 = vadd.xlane.f32.xlu0 %v600_v36  ;;  %v591_v40 = vsel %vm464_vm1, %v1130_v37, 0.0 }
 0x29d   : > { %v1459_v38 = vpop.eup %1131 }
 0x29e   : > { %v594_v39 = vsel %vm464_vm1, %v1459_v38, 0.0 }
 0x29f   : > { %595 = vadd.xlane.f32.xlu1 %v594_v39  ;;  %v408_v39 = vld [vmem:[%s1611_s2] sm:$0xff] }
 0x2a1   : > { %592 = vadd.xlane.f32.xlu0 %v591_v40 }
 0x2a7   : > { %741 = vrot.lane.b32.xlu2 %v461_v6, %s1251_s24 }
 0x2b5   : > { %663 = vrot.lane.b32.xlu0 %v1428_v5, %s1251_s24 }
 0x2b8   : > { %1115 = vrot.lane.b32.xlu1 %v1114_v41, %s1251_s24  ;;  %s958_s24 = sshll.u32 %s403_s21, 4  ;;  %s959_s24 = int_to_ptr.vmem [resolvable:$true] %s958_s24 }
 0x302   : > { %v599_v42 = vpop.xlane.xlu2 %598 }
 0x303   : > { %1133 = vrcp.f32 %v599_v42  ;;  %vm636_vm3 = vweird.f32 %v599_v42  ;;  %v640_v2 = vand.u32 2147483647, %v599_v42  ;;  %v642_v3 = vand.u32 2147483648, %v599_v42 }
 0x305   : > { %v643_v15 = vor.u32 1.1754944e-38, %v642_v3  ;;  %vm641_vm12 = vcmp.eq.f32.partialorder %v640_v2, 8.507059e+37 }
 0x309   : > { %v1134_v44 = vpop.eup %1133 }
 0x30a   : > { %v632_v47 = vmul.f32 %v1134_v44, %v599_v42  ;;  %vm637_vm4 = vweird.f32 %v1134_v44  ;;  %v742_v29 = vpop.permute.xlu2 %741 }
 0x30b   : > { %vm1473_vm8 = vmor %vm636_vm3, %vm637_vm4  ;;  %vm780_vm4 = vcmask 130048  }
 0x30c   : > { %v1466_v43 = vpop.xlane.xlu0 %601  ;;  %v633_v49 = vsub.f32 1.0, %v632_v47 }
 0x30d   : > { %v656_v22 = vand.u32 2147483648, %v1466_v43  ;;  %vm650_vm15 = vweird.f32 %v1466_v43  ;;  %v654_v25 = vand.u32 2147483647, %v1466_v43 }
 0x30e   : > { %v634_v55 = vmul.f32 %v1134_v44, %v633_v49 }
 0x30f   : > { %v657_v31 = vor.u32 1.1754944e-38, %v656_v22  ;;  %vm655_vm3 = vcmp.eq.f32.partialorder %v654_v25, 8.507059e+37  ;;  %v421_v22 = vld [vmem:[%s1618_s9 + $0x28] sm:$0xff]  ;;  %v418_v25 = vld [vmem:[%s1618_s9 + $0x10] sm:$0xff] }
 0x310   : > { %v635_v62 = vadd.f32 %v1134_v44, %v634_v55 }
 0x312   : > { %v596_v45 = vpop.xlane.xlu1 %595  ;;  %v639_v11 = vsel %vm1473_vm8, %v1134_v44, %v635_v62  ;;  %v412_v62 = vld [vmem:[%s1616_s7] sm:$0xff] }
 0x313   : > { %1135 = vrcp.f32 %v596_v45  ;;  %v628_v5 = vand.u32 2147483648, %v596_v45  ;;  %vm622_vm9 = vweird.f32 %v596_v45  ;;  %v626_v8 = vand.u32 2147483647, %v596_v45 }
 0x314   : > { %1137 = vrcp.f32 %v1466_v43  ;;  %v593_v46 = vpop.xlane.xlu0 %592  ;;  %v644_v18 = vsel %vm641_vm12, %v643_v15, %v639_v11 }
 0x315   : > { %1139 = vrcp.f32 %v593_v46  ;;  %v614_v59 = vand.u32 2147483648, %v593_v46  ;;  %v612_v61 = vand.u32 2147483647, %v593_v46  ;;  %vm608_vm5 = vweird.f32 %v593_v46 }
 0x316   : > { %v629_v16 = vor.u32 1.1754944e-38, %v628_v5  ;;  %vm627_vm13 = vcmp.eq.f32.partialorder %v626_v8, 8.507059e+37  ;;  %v661_v28 = vmul.f32 %v1451_v26, %v644_v18 }
 0x317   : > { %v615_v6 = vor.u32 1.1754944e-38, %v614_v59  ;;  %vm613_vm10 = vcmp.eq.f32.partialorder %v612_v61, 8.507059e+37 }
 0x319   : > { %v1136_v48 = vpop.eup %1135 }
 0x31a   : > { %v1469_v50 = vpop.eup %1137  ;;  %v618_v51 = vmul.f32 %v1136_v48, %v596_v45  ;;  %vm623_vm6 = vweird.f32 %v1136_v48 }
 0x31b   : > { %v1140_v52 = vpop.eup %1139  ;;  %v646_v56 = vmul.f32 %v1469_v50, %v1466_v43  ;;  %vm624_vm11 = vmor %vm622_vm9, %vm623_vm6  ;;  %vm651_vm14 = vweird.f32 %v1469_v50  ;;  %vm886_vm9 = vcmask 523264  }
 0x31c   : > { %v619_v53 = vsub.f32 1.0, %v618_v51  ;;  %v604_v54 = vmul.f32 %v1140_v52, %v593_v46  ;;  %vm609_vm2 = vweird.f32 %v1140_v52 }
 0x31d   : > { %v647_v63 = vsub.f32 1.0, %v646_v56  ;;  %vm610_vm7 = vmor %vm608_vm5, %vm609_vm2  ;;  %vm782_vm5 = vcmask 195584  }
 0x31e   : > { %v620_v57 = vmul.f32 %v1136_v48, %v619_v53  ;;  %v605_v58 = vsub.f32 1.0, %v604_v54  ;;  %vm652_vm2 = vmor %vm650_vm15, %vm651_vm14 }
 0x31f   : > { %v648_v12 = vmul.f32 %v1469_v50, %v647_v63 }
 0x320   : > { %v606_v60 = vmul.f32 %v1140_v52, %v605_v58  ;;  %v621_v0 = vadd.f32 %v1136_v48, %v620_v57  ;;  %v415_v58 = vld [vmem:[%s1616_s7 + $0x18] sm:$0xff] }
 0x321   : > { %v649_v20 = vadd.f32 %v1469_v50, %v648_v12 }
 0x322   : > { %v607_v1 = vadd.f32 %v1140_v52, %v606_v60  ;;  %v625_v14 = vsel %vm624_vm11, %v1136_v48, %v621_v0  ;;  %v413_v60 = vld [vmem:[%s1616_s7 + $0x8] sm:$0xff] }
 0x323   : > { %v630_v19 = vsel %vm627_vm13, %v629_v16, %v625_v14  ;;  %v653_v30 = vsel %vm652_vm2, %v1469_v50, %v649_v20  ;;  %v1119_v14 = vld [vmem:[%s1612_s3] ss:$0 sm:$0xff]  ;;  %v423_v20 = vld [vmem:[%s1618_s9 + $0x38] sm:$0xff] }
 0x324   : > { %v611_v9 = vsel %vm610_vm7, %v1140_v52, %v607_v1  ;;  %v660_v27 = vmul.f32 %v1459_v38, %v630_v19  ;;  %v658_v32 = vsel %vm655_vm3, %v657_v31, %v653_v30  ;;  %v410_v38 = vld [vmem:[%s1611_s2 + $0x10] sm:$0xff]  ;;  %v1255_v52 = vmov 32.0   ;;  %898 = vmatpush.msrb.mxu0 %v423_v20 }
 0x325   : > { %v616_v10 = vsel %vm613_vm10, %v615_v6, %v611_v9  ;;  %v662_v33 = vmul.f32 %v1455_v35, %v658_v32  ;;  %v409_v35 = vld [vmem:[%s1611_s2 + $0x8] sm:$0xff]  ;;  %1141 = vrcp.f32 %v1255_v52 }
 0x326   : > { %v659_v13 = vmul.f32 %v1130_v37, %v616_v10  ;;  %v411_v37 = vld [vmem:[%s1611_s2 + $0x18] sm:$0xff] }
 0x327   : > { %v664_v17 = vpop.permute.xlu0 %663 }
 0x328   : > { %684 = vmatpush.msrb.mxu2 %v664_v17  ;;  %v1120_v17 = vld [vmem:[%s1613_s4] ss:$0 sm:$0xff] }
 0x329   : > { %1048 = vmatmul.msk.f32.vlgmr.msrb.gmra.mxu2 %vm464_vm1, %v659_v13 }
 0x32a   : > { %v1116_v21 = vpop.permute.xlu1 %1115  ;;  %799 = vmatpush.msra.mxu2 %v411_v37 }
 0x32b   : > { %v1118_v23 = vunpack.i.h.bf16 %v1116_v21  ;;  %v1117_v24 = vunpack.i.l.bf16 %v1116_v21  ;;  %v1142_v53 = vpop.eup %1141  ;;  %v422_v21 = vld [vmem:[%s1618_s9 + $0x30] sm:$0xff] }
 0x32c   : > { %800 = vmatpush.msra.mxu2 %v410_v38  ;;  %v812_v54 = vmul.f32 32.0, %v1142_v53  ;;  %899 = vmatpush.msrb.mxu0 %v422_v21 }
 0x32d   : > { %710 = vmatpush.msrb.mxu3 %v1117_v24  ;;  %736 = vmatpush.msra.mxu1 %v1118_v23  ;;  %v420_v23 = vld [vmem:[%s1618_s9 + $0x20] sm:$0xff]  ;;  %v419_v24 = vld [vmem:[%s1618_s9 + $0x18] sm:$0xff] }
 0x32e   : > { %1049 = vmatmul.msk.f32.vlgmr.msrb.gmra.mxu3 %vm464_vm1, %v660_v27  ;;  %1050 = vmatmul.msk.f32.vlgmr.msra.gmra.mxu1 %vm464_vm1, %v661_v28  ;;  %v813_v55 = vsub.f32 1.0, %v812_v54  ;;  %v417_v27 = vld [vmem:[%s1618_s9 + $0x8] sm:$0xff]  ;;  %v416_v28 = vld [vmem:[%s1618_s9] sm:$0xff] }
 0x32f   : > { %762 = vmatpush.msrb.mxu1 %v742_v29  ;;  %801 = vmatpush.msra.mxu2 %v409_v35  ;;  %v1121_v29 = vld [vmem:[%s1617_s8] ss:$0 sm:$0xff] }
 0x330   : > { %v814_v56 = vmul.f32 %v1142_v53, %v813_v55  ;;  %866 = vmatpush.msra.mxu3 %v415_v58  ;;  %900 = vmatpush.msrb.mxu0 %v421_v22 }
 0x331   : > { %802 = vmatpush.msra.mxu2 %v408_v39 }
 0x332   : > { %v815_v57 = vadd.f32 %v1142_v53, %v814_v56  ;;  %901 = vmatpush.msrb.mxu0 %v420_v23 }
 0x334   : > { %902 = vmatpush.msrb.mxu0 %v419_v24 }
 0x336   : > { %1051 = vmatmul.msk.f32.vlgmr.msrb.gmra.mxu1 %vm464_vm1, %v662_v33  ;;  %903 = vmatpush.msrb.mxu0 %v418_v25 }
 0x338   : > { %904 = vmatpush.msrb.mxu0 %v417_v27 }
 0x33a   : > { %905 = vmatpush.msrb.mxu0 %v416_v28 }
 0x3ab   : > { %v738_v34 = vpop.f32.mrf.mxu1 }
 0x3ac   : > { %772 = vrot.lane.b32.xlu2 %v738_v34, %s1252_s19  ;;  %v686_v41 = vpop.f32.mrf.mxu2  ;;  %s960_s19 = sshll.u32 %s956_s15, 4  ;;  %s961_s19 = int_to_ptr.hbm [resolvable:$true] %s960_s19 }
 0x3b1   : > { %v712_v26 = vpop.f32.mrf.mxu3 }
 0x3b2   : > { %768 = vrot.lane.b32.xlu1 %v712_v26, %s1253_s23  ;;  %s946_s23 = scalar_lea.sflag [#allocation4], %s1402_s12 }
 0x3b3   : > { %v764_v36 = vpop.f32.mrf.mxu1 }
 0x3ba   : > { %776 = vrot.lane.b32.xlu1 %v764_v36, %s1254_s26  ;;  %s1193_s26 = sshra.s32 %s961_s19, 4  ;;  %s1194_s26 = int_to_ptr.hbm [resolvable:$true] %s1193_s26 }
 0x3bb   : > { %s1195_s25 = scalar_lea.hbm %s1194_s26, 8  ;;  %p1200_p0 = scmp.lt.s32.totalorder %s1194_s26, %s1620_s11 }
 0x3bc   : > { %p1196_p6 = scmp.ne.s32.totalorder %s1194_s26, %s1195_s25  ;;  %p1201_p1 = scmp.lt.s32.totalorder %s1199_s17, %s1195_s25 }
 0x3be   : > { %p1197_p9 = pnand %p1196_p6, %p1366_p11  ;;  %p1202_p3 = por %p1201_p1, %p1200_p0 }
 0x3c0   : > { %p1198_p13 = pneg %p1197_p9 }
 0x3c2   : > { %p1203_p4 = pnand %p1202_p3, %p1198_p13 }
 0x406   : > { %v773_v43 = vpop.permute.xlu2 %772 }
 0x424   : > { %v769_v40 = vpop.permute.xlu1 %768 }
 0x425   : > { %v779_v42 = vsel %vm464_vm1, %v686_v41, %v769_v40  ;;  %vm816_vm1 = vweird.f32 %v1142_v53  ;;  %v1122_v40 = vld [vmem:[%s1619_s10] ss:$0 sm:$0xff] }
 0x426   : > { %v781_v45 = vsel %vm780_vm4, %v779_v42, %v773_v43  ;;  %v1516_v59 = vsel %vm816_vm1, %v1142_v53, %v815_v57 }
 0x42c   : > { %v777_v44 = vpop.permute.xlu1 %776 }
 0x42d   : > { %v783_v46 = vsel %vm782_vm5, %v781_v45, %v777_v44 }
 0x42e   : > { %1052 = vmatmul.msk.f32.vlgmr.msra.gmra.mxu2 %vm431_vm0, %v783_v46 }
 0x4b1   : > { %v804_v47 = vpop.f32.mrf.mxu2 }
 0x4b2   : > { %v807_v48 = vadd.f32 %v804_v47, %v1424_v4  ;;  %v414_v4 = vld [vmem:[%s1616_s7 + $0x10] sm:$0xff] }
 0x4b3   : > { %867 = vmatpush.msra.mxu3 %v414_v4 }
 0x4b4   : > { %v808_v49 = vsel %vm431_vm0, %v807_v48, 0.0  ;;  %v819_v50 = vmul.f32 %v807_v48, %v807_v48 }
 0x4b5   : > { %809 = vadd.xlane.f32.xlu0 %v808_v49  ;;  %868 = vmatpush.msra.mxu3 %v413_v60 }
 0x4b6   : > { %v820_v51 = vsel %vm431_vm0, %v819_v50, 0.0 }
 0x4b7   : > { %821 = vadd.xlane.f32.xlu2 %v820_v51  ;;  %869 = vmatpush.msra.mxu3 %v412_v62 }
 0x528   : > { %v810_v61 = vpop.xlane.xlu0 %809 }
 0x529   : > { %v818_v63 = vmul.f32 %v1516_v59, %v810_v61 }
 0x52a   : > { %v822_v0 = vpop.xlane.xlu2 %821 }
 0x52b   : > { %v824_v1 = vmul.f32 %v818_v63, %v818_v63  ;;  %v823_v2 = vmul.f32 %v822_v0, %v1516_v59  ;;  %v827_v13 = vsub.f32 %v807_v48, %v818_v63  ;;  %v1124_v0 = vld [vmem:[%s1615_s6] ss:$0 sm:$0xff] }
 0x52d   : > { %v825_v3 = vsub.f32 %v823_v2, %v824_v1 }
 0x52f   : > { %v826_v5 = vmax.f32 %v825_v3, 0.0 }
 0x531   : > { %v828_v6 = vadd.f32 1e-05, %v826_v5 }
 0x533   : > { %1143 = vrsqrt.f32 %v828_v6  ;;  %vm835_vm7 = vweird.f32 %v828_v6 }
 0x539   : > { %v1144_v7 = vpop.eup %1143 }
 0x53a   : > { %v830_v8 = vmul.f32 %v1144_v7, %v828_v6  ;;  %vm836_vm6 = vweird.f32 %v1144_v7 }
 0x53b   : > { %vm837_vm8 = vmor %vm835_vm7, %vm836_vm6 }
 0x53c   : > { %v831_v9 = vmul.f32 %v1144_v7, %v830_v8 }
 0x53e   : > { %v832_v10 = vmul.f32 0.5, %v831_v9 }
 0x540   : > { %v833_v11 = vsub.f32 1.5, %v832_v10 }
 0x542   : > { %v834_v12 = vmul.f32 %v1144_v7, %v833_v11 }
 0x544   : > { %v838_v15 = vsel %vm837_vm8, %v1144_v7, %v834_v12 }
 0x545   : > { %v839_v16 = vmul.f32 %v838_v15, %v827_v13 }
 0x547   : > { %v843_v18 = vmul.f32 %v1119_v14, %v839_v16 }
 0x549   : > { %v847_v19 = vadd.f32 %v1120_v17, %v843_v18 }
 0x54b   : > { %1053 = vmatmul.msk.f32.vlgmr.msra.gmra.mxu3 %vm431_vm0, %v847_v19 }
 0x5ce   : > { %v871_v30 = vpop.f32.mrf.mxu3 }
 0x5cf   : > { %v872_v31 = vadd.f32 %v1121_v29, %v871_v30 }
 0x5d1   : > { %v874_v32 = vmul.f32 %v872_v31, %v872_v31 }
 0x5d3   : > { %v875_v33 = vmul.f32 %v874_v32, %v872_v31 }
 0x5d5   : > { %v876_v34 = vmul.f32 0.044715, %v875_v33 }
 0x5d7   : > { %v877_v26 = vadd.f32 %v876_v34, %v872_v31 }
 0x5d9   : > { %v878_v36 = vmul.f32 0.7978846, %v877_v26 }
 0x5db   : > { %1145 = vtanh.f32 %v878_v36 }
 0x5e1   : > { %v1146_v37 = vpop.eup %1145 }
 0x5e2   : > { %v880_v38 = vadd.f32 1.0, %v1146_v37 }
 0x5e4   : > { %v881_v35 = vmul.f32 0.5, %v880_v38 }
 0x5e6   : > { %v882_v39 = vmul.f32 %v881_v35, %v872_v31 }
 0x5e8   : > { %1054 = vmatmul.msk.f32.vlgmr.msrb.gmra.mxu0 %vm886_vm9, %v882_v39 }
 0x665   : > { %v907_v41 = vpop.f32.mrf.mxu0 }
 0x666   : > { %v908_v42 = vadd.f32 %v1122_v40, %v907_v41 }
 0x668   : > { %v910_v43 = vadd.f32 %v908_v42, %v847_v19 }
 0x66a   : > { %v911_v44 = vsel %vm431_vm0, %v910_v43, 0.0  ;;  %v915_v45 = vmul.f32 %v910_v43, %v910_v43 }
 0x66b   : > { %912 = vadd.xlane.f32.xlu1 %v911_v44 }
 0x66c   : > { %v916_v46 = vsel %vm431_vm0, %v915_v45, 0.0 }
 0x66d   : > { %917 = vadd.xlane.f32.xlu0 %v916_v46 }
 0x6de   : > { %v913_v47 = vpop.xlane.xlu1 %912 }
 0x6df   : > { %v914_v48 = vmul.f32 %v913_v47, %v1516_v59 }
 0x6e0   : > { %v918_v49 = vpop.xlane.xlu0 %917 }
 0x6e1   : > { %v920_v50 = vmul.f32 %v914_v48, %v914_v48  ;;  %v919_v51 = vmul.f32 %v918_v49, %v1516_v59  ;;  %v923_v61 = vsub.f32 %v910_v43, %v914_v48  ;;  %v1123_v59 = vld [vmem:[%s1614_s5] ss:$0 sm:$0xff] }
 0x6e3   : > { %v921_v52 = vsub.f32 %v919_v51, %v920_v50 }
 0x6e5   : > { %v922_v53 = vmax.f32 %v921_v52, 0.0 }
 0x6e7   : > { %v924_v54 = vadd.f32 1e-05, %v922_v53 }
 0x6e9   : > { %1147 = vrsqrt.f32 %v924_v54  ;;  %vm931_vm11 = vweird.f32 %v924_v54 }
 0x6ef   : > { %v1148_v55 = vpop.eup %1147 }
 0x6f0   : > { %v926_v56 = vmul.f32 %v1148_v55, %v924_v54  ;;  %vm932_vm10 = vweird.f32 %v1148_v55 }
 0x6f1   : > { %vm933_vm12 = vmor %vm931_vm11, %vm932_vm10 }
 0x6f2   : > { %v927_v57 = vmul.f32 %v1148_v55, %v926_v56 }
 0x6f4   : > { %v928_v58 = vmul.f32 0.5, %v927_v57 }
 0x6f6   : > { %v929_v4 = vsub.f32 1.5, %v928_v58 }
 0x6f8   : > { %v930_v60 = vmul.f32 %v1148_v55, %v929_v4 }
 0x6fa   : > { %v934_v62 = vsel %vm933_vm12, %v1148_v55, %v930_v60 }
 0x6fb   : > { %v935_v63 = vmul.f32 %v934_v62, %v923_v61 }
 0x6fd   : > { %v939_v1 = vmul.f32 %v1123_v59, %v935_v63 }
 0x6ff   : > { %v943_v2 = vadd.f32 %v1124_v0, %v939_v1 }
 0x701   : > { %944 = vst.msk [vmem:[%s403_s21] sm:$0xff] %vm431_vm0, %v943_v2 }
 0x702   : > { %1206 = shalt.err (!%p1203_p4)
}
 0x703   : > { %1061 = dma.vmem_to_hbm [thread:$0]  (%p1366_p11), %s959_s24, 128, %s961_s19, %s946_s23  }
 0x704 PF: > { %s1638_s12 = sld [smem:[#allocation8_spill]]  ;;  %p1640_p7 = scmp.ge.s32.totalorder %s1245_s20, 2 }
 0x706   : > { %p1068_p5 = pnand %p1640_p7, %p1370_p12 }
 0x708   : > { %p1069_p8 = pneg %p1068_p5 }
 0x70a   : > { %s972_s15 = sand.u32 1, %s1638_s12  }
 0x70b   : > { %s973_s16 = scalar_lea.sflag [#allocation4], %s972_s15 }
 0x70c   : > { %1228 = dma.done.wait (%p1069_p8), %s973_s16, 128  }
 0x70d   : > { %1230 = vsyncadd (%p1069_p8), %s973_s16, 4294967168  ;;  %s1641_s20 = sld [smem:[#allocation10_spill]]  ;;  %s1644_s17 = smov %s1237_s18 }
 0x70e   : > { %s1642_s30 = sld [smem:[#allocation9_spill]] }
 0x70f   : > { %s1643_s19 = sld [smem:[#allocation11_spill]] }
 0x713   : > { %p24_p10 = scmp.ge.s32.totalorder %s1641_s20, 4  }
 0x714   : > { %s1645_s18 = smov %s1642_s30 }
 0x715   :  { %26 = sbr.rel (!%p24_p10) target bundleno = 5 (0x5), region = 109 }
 0x71a   :  { %979 = vsyncpa [#allocation3], 1 }
 0x71b   :  { %981 = vsyncpa [#allocation3 + $0x1], 1 }
 0x71c   :  { %982 = vsyncpa [#allocation4], 1 }
 0x71d   :  { %984 = vsyncpa [#allocation4 + $0x1], 1 }

// kernel: tpu_custom_call.1
= control target key start
LH: loop header
LB: loop body
LE: loop exit
PB: predicated region body
PF: predicated region fallthrough
CT: control target
= control target key end

     0   :  { %16 = vsyncpa [#allocation3], 0  ;;  %s1609_s0 = inlined_call_operand.hbm [shape: f32[2,8,32], index: 0, kind: input, shape index: {}]   ;;  %s1610_s1 = inlined_call_operand.vmem [shape: f32[32,96], index: 1, kind: input, shape index: {}]   ;;  %s1611_s2 = inlined_call_operand.vmem [shape: f32[32,32], index: 2, kind: input, shape index: {}]   ;;  %s1612_s3 = inlined_call_operand.vmem [shape: f32[1,32], index: 3, kind: input, shape index: {}]   ;;  %s1613_s4 = inlined_call_operand.vmem [shape: f32[1,32], index: 4, kind: input, shape index: {}]   ;;  %s1614_s5 = inlined_call_operand.vmem [shape: f32[1,32], index: 5, kind: input, shape index: {}]   ;;  %s1615_s6 = inlined_call_operand.vmem [shape: f32[1,32], index: 6, kind: input, shape index: {}]   ;;  %s1616_s7 = inlined_call_operand.vmem [shape: f32[32,64], index: 7, kind: input, shape index: {}]   ;;  %s1617_s8 = inlined_call_operand.vmem [shape: f32[1,64], index: 8, kind: input, shape index: {}]   ;;  %s1618_s9 = inlined_call_operand.vmem [shape: f32[64,32], index: 9, kind: input, shape index: {}]   ;;  %s1619_s10 = inlined_call_operand.vmem [shape: f32[1,32], index: 10, kind: input, shape index: {}]   ;;  %s1620_s11 = inlined_call_operand.hbm [shape: f32[2,8,32], index: 11, kind: output, shape index: {}]  }
   0x1   :  { %18 = vsyncpa [#allocation3 + $0x1], 0 }
   0x2   :  { %19 = vsyncpa [#allocation4], 0 }
   0x3   :  { %21 = vsyncpa [#allocation4 + $0x1], 0  ;;  %s1316_s17 = smov 0   ;;  %s1318_s18 = smov 0  }
   0x4   :  { %s1320_s19 = smov 0   ;;  %s1322_s20 = smov 0  }
   0x5 LB: > { %1626 = sst [smem:[#allocation8_spill]] %s1233_s17  ;;  %s1337_s21 = sadd.s32 4294967295, %s1245_s20   ;;  %s1245_s20 = sphi %s1322_s20, %s1641_s20   ;;  %s1241_s19 = sphi %s1320_s19, %s1643_s19   ;;  %s1237_s18 = sphi %s1318_s18, %s1645_s18   ;;  %s1233_s17 = sphi %s1316_s17, %s1644_s17  }
   0x6   : > { %1627 = sst [smem:[#allocation9_spill]] %s1241_s19  ;;  %s1031_s22 = sadd.s32 4294967294, %s1245_s20  }
   0x7   : > { %s1341_s23 = sadd.s32 1, %s1245_s20   ;;  %s34_s24 = sadd.s32 1, %s1241_s19 }
   0x8   : > { %1628 = sst [smem:[#allocation10_spill]] %s1341_s23  ;;  %s31_s25 = ssub.s32 %s1245_s20, %s1341_s23 }
   0x9   : > { %p41_p0 = scmp.ne.s32.totalorder %s1241_s19, %s1237_s18  ;;  %p32_p1 = scmp.eq.s32.totalorder %s31_s25, 0 }
   0xa   : > { %p42_p2 = scmp.eq.s32.totalorder %s1245_s20, 0  ;;  %p47_p3 = scmp.ne.s32.totalorder %s1237_s18, %s1233_s17 }
   0xb   : > { %p48_p4 = scmp.eq.s32.totalorder %s1337_s21, 0  ;;  %p281_p7 = scmp.eq.s32.totalorder %s1337_s21, 1 }
   0xc   : > { %s1353_s26 = scalar_select %p32_p1, %s1241_s19, %s34_s24  }
   0xd   : > { %p1355_p5 = por %p42_p2, %p41_p0  ;;  %p1359_p6 = por %p48_p4, %p47_p3 }
   0xe   : > { %1629 = sst [smem:[#allocation11_spill]] %s1353_s26  ;;  %p287_p8 = scmp.eq.s32.totalorder %s1031_s22, 1 }
   0xf   : > { %p1071_p10 = scmp.lt.s32.totalorder %s1245_s20, 2  ;;  %p1366_p11 = por %p281_p7, %p41_p0 }
  0x10   : > { %p1370_p12 = por %p287_p8, %p47_p3  ;;  %s337_s12 = sand.u32 1, %s1241_s19  }
  0x11   : > { %s1035_s13 = sshll.u32 %s1245_s20, 3  ;;  %s1034_s14 = sshll.u32 %s337_s12, 3 }
  0x12   : > { %s1633_s30 = scalar_select %p1370_p12, 1, 0 }
  0x13   : > { %s345_s24 = scalar_lea.hbm %s1609_s0, %s1035_s13  ;;  %s341_s22 = scalar_lea.vmem [#allocation2], %s1034_s14 }
  0x14   : > { %1634 = sst [smem:[#allocation12_spill]] %s1633_s30  ;;  %s347_s25 = sshll.u32 %s345_s24, 4  ;;  %s348_s25 = int_to_ptr.hbm [resolvable:$true] %s347_s25 }
  0x15   : > { %s349_s26 = sshll.u32 %s341_s22, 4  ;;  %p1381_p13 = pnand %p1071_p10, %p1355_p5  ;;  %s350_s26 = int_to_ptr.vmem [resolvable:$true] %s349_s26 }
  0x16   : > { %p1036_p0 = scmp.ge.s32.totalorder %s1245_s20, 1  ;;  %p354_p1 = scmp.lt.s32.totalorder %s1245_s20, 3 }
  0x17   : > { %s338_s19 = scalar_lea.sflag [#allocation3], %s337_s12  ;;  %s1149_s30 = sshra.s32 %s348_s25, 4  ;;  %s1150_s30 = int_to_ptr.hbm [resolvable:$true] %s1149_s30 }
  0x18   : > { %s1151_s17 = scalar_lea.hbm %s1150_s30, 8  ;;  %p1153_p3 = pneg %p1381_p13 }
  0x19   : > { %p1152_p2 = scmp.ne.s32.totalorder %s1150_s30, %s1151_s17  ;;  %s1156_s27 = scalar_lea.hbm %s1609_s0, 16 }
  0x1a   : > { %p1157_p5 = scmp.lt.s32.totalorder %s1150_s30, %s1609_s0  ;;  %p1158_p8 = scmp.lt.s32.totalorder %s1156_s27, %s1151_s17 }
  0x1b   : > { %p1154_p4 = pnand %p1153_p3, %p1152_p2 }
  0x1c   : > { %p1159_p10 = por %p1158_p8, %p1157_p5 }
  0x1d   : > { %p1155_p7 = pneg %p1154_p4 }
  0x1f   : > { %p1160_p9 = pnand %p1159_p10, %p1155_p7 }
  0x21   : > { %1163 = shalt.err (!%p1160_p9)
}
  0x22   : > { %1066 = dma.hbm_to_vmem [thread:$0]  (!%p1381_p13), %s348_s25, 128, %s350_s26, %s338_s19  }
  0x23   : > { %p355_p2 = pnand %p1036_p0, %p354_p1 }
  0x24   : > { %s1402_s12 = sand.u32 (!%p355_p2), 1, %s1237_s18  }
  0x25   : > { %358 = sbr.rel (%p355_p2) target bundleno = 1796 (0x704), region = 64  ;;  %s1037_s17 = sshll.u32 (!%p355_p2), %s1402_s12, 3 }
  0x26   : > { %s361_s30 = scalar_lea.sflag (!%p355_p2), [#allocation3], %s1402_s12  ;;  %s364_s24 = scalar_lea.vmem (!%p355_p2), [#allocation2], %s1037_s17 }
  0x2a   : > { %1224 = dma.done.wait (%p1359_p6), %s361_s30, 128  }
  0x2b   : > { %1226 = vsyncadd (%p1359_p6), %s361_s30, 4294967168  ;;  %v407_v0 = vld [vmem:[%s1610_s1 + $0x18] sm:$0xff]  ;;  %v406_v1 = vld [vmem:[%s1610_s1 + $0x10] sm:$0xff]  ;;  %vm431_vm0 = vcmask 261120   ;;  %s1247_s28 = smov 104   ;;  %s1248_s15 = smov 120  }
  0x2c   : > { %447 = vmatpush.msra.mxu0 %v407_v0  ;;  %v405_v2 = vld [vmem:[%s1610_s1 + $0x8] sm:$0xff]  ;;  %v404_v3 = vld [vmem:[%s1610_s1] sm:$0xff]  ;;  %s1249_s16 = smov 112   ;;  %s1250_s30 = smov 96   ;;  %vm464_vm1 = vcmask 64512  }
  0x2d   : > { %v1424_v4 = vld [vmem:[%s364_s24] sm:$0xff]  ;;  %s1251_s24 = smov 64   ;;  %s1252_s19 = smov 16  }
  0x2e   : > { %448 = vmatpush.msra.mxu0 %v406_v1  ;;  %s1253_s23 = smov 8   ;;  %s1254_s26 = smov 24  }
  0x2f   : > { %s1056_s22 = sshll.u32 %s1337_s21, 3  ;;  %s403_s21 = scalar_lea.vmem [#allocation5], %s1037_s17 }
  0x30   : > { %449 = vmatpush.msra.mxu0 %v405_v2  ;;  %s1199_s17 = scalar_lea.hbm %s1620_s11, 16 }
  0x32   : > { %450 = vmatpush.msra.mxu0 %v404_v3 }
  0x33   : > { %1039 = vmatmul.msk.f32.vlgmr.msra.gmra.mxu0 %vm431_vm0, %v1424_v4 }
  0xb0   : > { %v1428_v5 = vpop.f32.mrf.mxu0 }
  0xb1   : > { %460 = vrot.lane.b32.xlu1 %v1428_v5, %s1247_s28  ;;  %456 = vrot.lane.b32.xlu0 %v1428_v5, %s1248_s15  ;;  %s956_s15 = scalar_lea.hbm %s1620_s11, %s1056_s22 }
  0xb9   : > { %458 = vrot.lane.b32.xlu0 %v1428_v5, %s1249_s16 }
 0x123   : > { %v461_v6 = vpop.permute.xlu1 %460  ;;  %v1433_v7 = vpop.permute.xlu0 %456 }
 0x124   : > { %541 = vrot.lane.b32.xlu0 %v461_v6, %s1250_s30  ;;  %489 = vrot.lane.b32.xlu1 %v1433_v7, %s1250_s30 }
 0x12b   : > { %v459_v8 = vpop.permute.xlu0 %458 }
 0x12c   : > { %515 = vrot.lane.b32.xlu2 %v459_v8, %s1250_s30  ;;  %v1114_v41 = vpack.i.bf16 %v459_v8, %v1433_v7 }
 0x134   : > { %462 = vrot.lane.b32.xlu2 %v1428_v5, %s1250_s30 }
 0x186   : > { %v516_v9 = vpop.permute.xlu2 %515 }
 0x187   : > { %1044 = vmatpush.xpose.msk.msra.mxu3 %vm464_vm1, %v516_v9 }
 0x18a   : > { %1045 = vmatmul.msk.f32.vlgmr.msra.gmra.mxu3 %vm464_vm1, %v459_v8 }
 0x18e   : > { %v463_v10 = vpop.permute.xlu2 %462 }
 0x18f   : > { %1040 = vmatpush.xpose.msk.msra.mxu1 %vm464_vm1, %v463_v10 }
 0x192   : > { %1041 = vmatmul.msk.f32.vlgmr.msra.gmra.mxu1 %vm464_vm1, %v1428_v5 }
 0x196   : > { %v490_v11 = vpop.permute.xlu1 %489  ;;  %v542_v12 = vpop.permute.xlu0 %541 }
 0x197   : > { %1042 = vmatpush.xpose.msk.msra.mxu2 %vm464_vm1, %v490_v11  ;;  %1046 = vmatpush.xpose.msk.msrb.mxu1 %vm464_vm1, %v542_v12 }
 0x19a   : > { %1043 = vmatmul.msk.f32.vlgmr.msra.gmra.mxu2 %vm464_vm1, %v1433_v7  ;;  %1047 = vmatmul.msk.f32.vlgmr.msrb.gmra.mxu1 %vm464_vm1, %v461_v6 }
 0x20d   : > { %v538_v13 = vpop.f32.mrf.mxu3 }
 0x20e   : > { %v573_v14 = vsel %vm464_vm1, %v538_v13, -inf }
 0x20f   : > { %574 = vmax.xlane.f32.xlu2 %v573_v14  ;;  %v486_v15 = vpop.f32.mrf.mxu1 }
 0x210   : > { %v567_v16 = vsel %vm464_vm1, %v486_v15, -inf }
 0x217   : > { %568 = vmax.xlane.f32.xlu2 %v567_v16  ;;  %v564_v17 = vpop.f32.mrf.mxu1 }
 0x218   : > { %v576_v18 = vsel %vm464_vm1, %v564_v17, -inf }
 0x219   : > { %577 = vmax.xlane.f32.xlu0 %v576_v18 }
 0x21d   : > { %v512_v19 = vpop.f32.mrf.mxu2 }
 0x21e   : > { %v570_v20 = vsel %vm464_vm1, %v512_v19, -inf }
 0x21f   : > { %571 = vmax.xlane.f32.xlu1 %v570_v20 }
 0x282   : > { %v575_v21 = vpop.xlane.xlu2 %574 }
 0x283   : > { %v581_v22 = vsub.f32 %v538_v13, %v575_v21 }
 0x285   : > { %v587_v23 = vmul.f32 1.442695, %v581_v22 }
 0x287   : > { %1125 = vpow2.f32 %v587_v23 }
 0x28a   : > { %v569_v24 = vpop.xlane.xlu2 %568 }
 0x28b   : > { %v579_v28 = vsub.f32 %v486_v15, %v569_v24 }
 0x28c   : > { %v578_v25 = vpop.xlane.xlu0 %577 }
 0x28d   : > { %v1451_v26 = vpop.eup %1125  ;;  %v582_v27 = vsub.f32 %v564_v17, %v578_v25  ;;  %v583_v31 = vmul.f32 1.442695, %v579_v28 }
 0x28e   : > { %v597_v29 = vsel %vm464_vm1, %v1451_v26, 0.0 }
 0x28f   : > { %v589_v30 = vmul.f32 1.442695, %v582_v27  ;;  %598 = vadd.xlane.f32.xlu2 %v597_v29 }
 0x291   : > { %1127 = vpow2.f32 %v589_v30 }
 0x292   : > { %v572_v32 = vpop.xlane.xlu1 %571  ;;  %1129 = vpow2.f32 %v583_v31 }
 0x293   : > { %v580_v33 = vsub.f32 %v512_v19, %v572_v32 }
 0x295   : > { %v585_v34 = vmul.f32 1.442695, %v580_v33 }
 0x297   : > { %v1455_v35 = vpop.eup %1127  ;;  %1131 = vpow2.f32 %v585_v34 }
 0x298   : > { %v600_v36 = vsel %vm464_vm1, %v1455_v35, 0.0  ;;  %v1130_v37 = vpop.eup %1129 }
 0x299   : > { %601 = vadd.xlane.f32.xlu0 %v600_v36  ;;  %v591_v40 = vsel %vm464_vm1, %v1130_v37, 0.0 }
 0x29d   : > { %v1459_v38 = vpop.eup %1131 }
 0x29e   : > { %v594_v39 = vsel %vm464_vm1, %v1459_v38, 0.0 }
 0x29f   : > { %595 = vadd.xlane.f32.xlu1 %v594_v39  ;;  %v408_v39 = vld [vmem:[%s1611_s2] sm:$0xff] }
 0x2a1   : > { %592 = vadd.xlane.f32.xlu0 %v591_v40 }
 0x2a7   : > { %741 = vrot.lane.b32.xlu2 %v461_v6, %s1251_s24 }
 0x2b5   : > { %663 = vrot.lane.b32.xlu0 %v1428_v5, %s1251_s24 }
 0x2b8   : > { %1115 = vrot.lane.b32.xlu1 %v1114_v41, %s1251_s24  ;;  %s958_s24 = sshll.u32 %s403_s21, 4  ;;  %s959_s24 = int_to_ptr.vmem [resolvable:$true] %s958_s24 }
 0x302   : > { %v599_v42 = vpop.xlane.xlu2 %598 }
 0x303   : > { %1133 = vrcp.f32 %v599_v42  ;;  %vm636_vm3 = vweird.f32 %v599_v42  ;;  %v640_v2 = vand.u32 2147483647, %v599_v42  ;;  %v642_v3 = vand.u32 2147483648, %v599_v42 }
 0x305   : > { %v643_v15 = vor.u32 1.1754944e-38, %v642_v3  ;;  %vm641_vm12 = vcmp.eq.f32.partialorder %v640_v2, 8.507059e+37 }
 0x309   : > { %v1134_v44 = vpop.eup %1133 }
 0x30a   : > { %v632_v47 = vmul.f32 %v1134_v44, %v599_v42  ;;  %vm637_vm4 = vweird.f32 %v1134_v44  ;;  %v742_v29 = vpop.permute.xlu2 %741 }
 0x30b   : > { %vm1473_vm8 = vmor %vm636_vm3, %vm637_vm4  ;;  %vm780_vm4 = vcmask 130048  }
 0x30c   : > { %v1466_v43 = vpop.xlane.xlu0 %601  ;;  %v633_v49 = vsub.f32 1.0, %v632_v47 }
 0x30d   : > { %v656_v22 = vand.u32 2147483648, %v1466_v43  ;;  %vm650_vm15 = vweird.f32 %v1466_v43  ;;  %v654_v25 = vand.u32 2147483647, %v1466_v43 }
 0x30e   : > { %v634_v55 = vmul.f32 %v1134_v44, %v633_v49 }
 0x30f   : > { %v657_v31 = vor.u32 1.1754944e-38, %v656_v22  ;;  %vm655_vm3 = vcmp.eq.f32.partialorder %v654_v25, 8.507059e+37  ;;  %v421_v22 = vld [vmem:[%s1618_s9 + $0x28] sm:$0xff]  ;;  %v418_v25 = vld [vmem:[%s1618_s9 + $0x10] sm:$0xff] }
 0x310   : > { %v635_v62 = vadd.f32 %v1134_v44, %v634_v55 }
 0x312   : > { %v596_v45 = vpop.xlane.xlu1 %595  ;;  %v639_v11 = vsel %vm1473_vm8, %v1134_v44, %v635_v62  ;;  %v412_v62 = vld [vmem:[%s1616_s7] sm:$0xff] }
 0x313   : > { %1135 = vrcp.f32 %v596_v45  ;;  %v628_v5 = vand.u32 2147483648, %v596_v45  ;;  %vm622_vm9 = vweird.f32 %v596_v45  ;;  %v626_v8 = vand.u32 2147483647, %v596_v45 }
 0x314   : > { %1137 = vrcp.f32 %v1466_v43  ;;  %v593_v46 = vpop.xlane.xlu0 %592  ;;  %v644_v18 = vsel %vm641_vm12, %v643_v15, %v639_v11 }
 0x315   : > { %1139 = vrcp.f32 %v593_v46  ;;  %v614_v59 = vand.u32 2147483648, %v593_v46  ;;  %v612_v61 = vand.u32 2147483647, %v593_v46  ;;  %vm608_vm5 = vweird.f32 %v593_v46 }
 0x316   : > { %v629_v16 = vor.u32 1.1754944e-38, %v628_v5  ;;  %vm627_vm13 = vcmp.eq.f32.partialorder %v626_v8, 8.507059e+37  ;;  %v661_v28 = vmul.f32 %v1451_v26, %v644_v18 }
 0x317   : > { %v615_v6 = vor.u32 1.1754944e-38, %v614_v59  ;;  %vm613_vm10 = vcmp.eq.f32.partialorder %v612_v61, 8.507059e+37 }
 0x319   : > { %v1136_v48 = vpop.eup %1135 }
 0x31a   : > { %v1469_v50 = vpop.eup %1137  ;;  %v618_v51 = vmul.f32 %v1136_v48, %v596_v45  ;;  %vm623_vm6 = vweird.f32 %v1136_v48 }
 0x31b   : > { %v1140_v52 = vpop.eup %1139  ;;  %v646_v56 = vmul.f32 %v1469_v50, %v1466_v43  ;;  %vm624_vm11 = vmor %vm622_vm9, %vm623_vm6  ;;  %vm651_vm14 = vweird.f32 %v1469_v50  ;;  %vm886_vm9 = vcmask 523264  }
 0x31c   : > { %v619_v53 = vsub.f32 1.0, %v618_v51  ;;  %v604_v54 = vmul.f32 %v1140_v52, %v593_v46  ;;  %vm609_vm2 = vweird.f32 %v1140_v52 }
 0x31d   : > { %v647_v63 = vsub.f32 1.0, %v646_v56  ;;  %vm610_vm7 = vmor %vm608_vm5, %vm609_vm2  ;;  %vm782_vm5 = vcmask 195584  }
 0x31e   : > { %v620_v57 = vmul.f32 %v1136_v48, %v619_v53  ;;  %v605_v58 = vsub.f32 1.0, %v604_v54  ;;  %vm652_vm2 = vmor %vm650_vm15, %vm651_vm14 }
 0x31f   : > { %v648_v12 = vmul.f32 %v1469_v50, %v647_v63 }
 0x320   : > { %v606_v60 = vmul.f32 %v1140_v52, %v605_v58  ;;  %v621_v0 = vadd.f32 %v1136_v48, %v620_v57  ;;  %v415_v58 = vld [vmem:[%s1616_s7 + $0x18] sm:$0xff] }
 0x321   : > { %v649_v20 = vadd.f32 %v1469_v50, %v648_v12 }
 0x322   : > { %v607_v1 = vadd.f32 %v1140_v52, %v606_v60  ;;  %v625_v14 = vsel %vm624_vm11, %v1136_v48, %v621_v0  ;;  %v413_v60 = vld [vmem:[%s1616_s7 + $0x8] sm:$0xff] }
 0x323   : > { %v630_v19 = vsel %vm627_vm13, %v629_v16, %v625_v14  ;;  %v653_v30 = vsel %vm652_vm2, %v1469_v50, %v649_v20  ;;  %v1119_v14 = vld [vmem:[%s1612_s3] ss:$0 sm:$0xff]  ;;  %v423_v20 = vld [vmem:[%s1618_s9 + $0x38] sm:$0xff] }
 0x324   : > { %v611_v9 = vsel %vm610_vm7, %v1140_v52, %v607_v1  ;;  %v660_v27 = vmul.f32 %v1459_v38, %v630_v19  ;;  %v658_v32 = vsel %vm655_vm3, %v657_v31, %v653_v30  ;;  %v410_v38 = vld [vmem:[%s1611_s2 + $0x10] sm:$0xff]  ;;  %v1255_v52 = vmov 32.0   ;;  %898 = vmatpush.msrb.mxu0 %v423_v20 }
 0x325   : > { %v616_v10 = vsel %vm613_vm10, %v615_v6, %v611_v9  ;;  %v662_v33 = vmul.f32 %v1455_v35, %v658_v32  ;;  %v409_v35 = vld [vmem:[%s1611_s2 + $0x8] sm:$0xff]  ;;  %1141 = vrcp.f32 %v1255_v52 }
 0x326   : > { %v659_v13 = vmul.f32 %v1130_v37, %v616_v10  ;;  %v411_v37 = vld [vmem:[%s1611_s2 + $0x18] sm:$0xff] }
 0x327   : > { %v664_v17 = vpop.permute.xlu0 %663 }
 0x328   : > { %684 = vmatpush.msrb.mxu2 %v664_v17  ;;  %v1120_v17 = vld [vmem:[%s1613_s4] ss:$0 sm:$0xff] }
 0x329   : > { %1048 = vmatmul.msk.f32.vlgmr.msrb.gmra.mxu2 %vm464_vm1, %v659_v13 }
 0x32a   : > { %v1116_v21 = vpop.permute.xlu1 %1115  ;;  %799 = vmatpush.msra.mxu2 %v411_v37 }
 0x32b   : > { %v1118_v23 = vunpack.i.h.bf16 %v1116_v21  ;;  %v1117_v24 = vunpack.i.l.bf16 %v1116_v21  ;;  %v1142_v53 = vpop.eup %1141  ;;  %v422_v21 = vld [vmem:[%s1618_s9 + $0x30] sm:$0xff] }
 0x32c   : > { %800 = vmatpush.msra.mxu2 %v410_v38  ;;  %v812_v54 = vmul.f32 32.0, %v1142_v53  ;;  %899 = vmatpush.msrb.mxu0 %v422_v21 }
 0x32d   : > { %710 = vmatpush.msrb.mxu3 %v1117_v24  ;;  %736 = vmatpush.msra.mxu1 %v1118_v23  ;;  %v420_v23 = vld [vmem:[%s1618_s9 + $0x20] sm:$0xff]  ;;  %v419_v24 = vld [vmem:[%s1618_s9 + $0x18] sm:$0xff] }
 0x32e   : > { %1049 = vmatmul.msk.f32.vlgmr.msrb.gmra.mxu3 %vm464_vm1, %v660_v27  ;;  %1050 = vmatmul.msk.f32.vlgmr.msra.gmra.mxu1 %vm464_vm1, %v661_v28  ;;  %v813_v55 = vsub.f32 1.0, %v812_v54  ;;  %v417_v27 = vld [vmem:[%s1618_s9 + $0x8] sm:$0xff]  ;;  %v416_v28 = vld [vmem:[%s1618_s9] sm:$0xff] }
 0x32f   : > { %762 = vmatpush.msrb.mxu1 %v742_v29  ;;  %801 = vmatpush.msra.mxu2 %v409_v35  ;;  %v1121_v29 = vld [vmem:[%s1617_s8] ss:$0 sm:$0xff] }
 0x330   : > { %v814_v56 = vmul.f32 %v1142_v53, %v813_v55  ;;  %866 = vmatpush.msra.mxu3 %v415_v58  ;;  %900 = vmatpush.msrb.mxu0 %v421_v22 }
 0x331   : > { %802 = vmatpush.msra.mxu2 %v408_v39 }
 0x332   : > { %v815_v57 = vadd.f32 %v1142_v53, %v814_v56  ;;  %901 = vmatpush.msrb.mxu0 %v420_v23 }
 0x334   : > { %902 = vmatpush.msrb.mxu0 %v419_v24 }
 0x336   : > { %1051 = vmatmul.msk.f32.vlgmr.msrb.gmra.mxu1 %vm464_vm1, %v662_v33  ;;  %903 = vmatpush.msrb.mxu0 %v418_v25 }
 0x338   : > { %904 = vmatpush.msrb.mxu0 %v417_v27 }
 0x33a   : > { %905 = vmatpush.msrb.mxu0 %v416_v28 }
 0x3ab   : > { %v738_v34 = vpop.f32.mrf.mxu1 }
 0x3ac   : > { %772 = vrot.lane.b32.xlu2 %v738_v34, %s1252_s19  ;;  %v686_v41 = vpop.f32.mrf.mxu2  ;;  %s960_s19 = sshll.u32 %s956_s15, 4  ;;  %s961_s19 = int_to_ptr.hbm [resolvable:$true] %s960_s19 }
 0x3b1   : > { %v712_v26 = vpop.f32.mrf.mxu3 }
 0x3b2   : > { %768 = vrot.lane.b32.xlu1 %v712_v26, %s1253_s23  ;;  %s946_s23 = scalar_lea.sflag [#allocation4], %s1402_s12 }
 0x3b3   : > { %v764_v36 = vpop.f32.mrf.mxu1 }
 0x3ba   : > { %776 = vrot.lane.b32.xlu1 %v764_v36, %s1254_s26  ;;  %s1193_s26 = sshra.s32 %s961_s19, 4  ;;  %s1194_s26 = int_to_ptr.hbm [resolvable:$true] %s1193_s26 }
 0x3bb   : > { %s1195_s25 = scalar_lea.hbm %s1194_s26, 8  ;;  %p1200_p0 = scmp.lt.s32.totalorder %s1194_s26, %s1620_s11 }
 0x3bc   : > { %p1196_p6 = scmp.ne.s32.totalorder %s1194_s26, %s1195_s25  ;;  %p1201_p1 = scmp.lt.s32.totalorder %s1199_s17, %s1195_s25 }
 0x3be   : > { %p1197_p9 = pnand %p1196_p6, %p1366_p11  ;;  %p1202_p3 = por %p1201_p1, %p1200_p0 }
 0x3c0   : > { %p1198_p13 = pneg %p1197_p9 }
 0x3c2   : > { %p1203_p4 = pnand %p1202_p3, %p1198_p13 }
 0x406   : > { %v773_v43 = vpop.permute.xlu2 %772 }
 0x424   : > { %v769_v40 = vpop.permute.xlu1 %768 }
 0x425   : > { %v779_v42 = vsel %vm464_vm1, %v686_v41, %v769_v40  ;;  %vm816_vm1 = vweird.f32 %v1142_v53  ;;  %v1122_v40 = vld [vmem:[%s1619_s10] ss:$0 sm:$0xff] }
 0x426   : > { %v781_v45 = vsel %vm780_vm4, %v779_v42, %v773_v43  ;;  %v1516_v59 = vsel %vm816_vm1, %v1142_v53, %v815_v57 }
 0x42c   : > { %v777_v44 = vpop.permute.xlu1 %776 }
 0x42d   : > { %v783_v46 = vsel %vm782_vm5, %v781_v45, %v777_v44 }
 0x42e   : > { %1052 = vmatmul.msk.f32.vlgmr.msra.gmra.mxu2 %vm431_vm0, %v783_v46 }
 0x4b1   : > { %v804_v47 = vpop.f32.mrf.mxu2 }
 0x4b2   : > { %v807_v48 = vadd.f32 %v804_v47, %v1424_v4  ;;  %v414_v4 = vld [vmem:[%s1616_s7 + $0x10] sm:$0xff] }
 0x4b3   : > { %867 = vmatpush.msra.mxu3 %v414_v4 }
 0x4b4   : > { %v808_v49 = vsel %vm431_vm0, %v807_v48, 0.0  ;;  %v819_v50 = vmul.f32 %v807_v48, %v807_v48 }
 0x4b5   : > { %809 = vadd.xlane.f32.xlu0 %v808_v49  ;;  %868 = vmatpush.msra.mxu3 %v413_v60 }
 0x4b6   : > { %v820_v51 = vsel %vm431_vm0, %v819_v50, 0.0 }
 0x4b7   : > { %821 = vadd.xlane.f32.xlu2 %v820_v51  ;;  %869 = vmatpush.msra.mxu3 %v412_v62 }
 0x528   : > { %v810_v61 = vpop.xlane.xlu0 %809 }
 0x529   : > { %v818_v63 = vmul.f32 %v1516_v59, %v810_v61 }
 0x52a   : > { %v822_v0 = vpop.xlane.xlu2 %821 }
 0x52b   : > { %v824_v1 = vmul.f32 %v818_v63, %v818_v63  ;;  %v823_v2 = vmul.f32 %v822_v0, %v1516_v59  ;;  %v827_v13 = vsub.f32 %v807_v48, %v818_v63  ;;  %v1124_v0 = vld [vmem:[%s1615_s6] ss:$0 sm:$0xff] }
 0x52d   : > { %v825_v3 = vsub.f32 %v823_v2, %v824_v1 }
 0x52f   : > { %v826_v5 = vmax.f32 %v825_v3, 0.0 }
 0x531   : > { %v828_v6 = vadd.f32 1e-05, %v826_v5 }
 0x533   : > { %1143 = vrsqrt.f32 %v828_v6  ;;  %vm835_vm7 = vweird.f32 %v828_v6 }
 0x539   : > { %v1144_v7 = vpop.eup %1143 }
 0x53a   : > { %v830_v8 = vmul.f32 %v1144_v7, %v828_v6  ;;  %vm836_vm6 = vweird.f32 %v1144_v7 }
 0x53b   : > { %vm837_vm8 = vmor %vm835_vm7, %vm836_vm6 }
 0x53c   : > { %v831_v9 = vmul.f32 %v1144_v7, %v830_v8 }
 0x53e   : > { %v832_v10 = vmul.f32 0.5, %v831_v9 }
 0x540   : > { %v833_v11 = vsub.f32 1.5, %v832_v10 }
 0x542   : > { %v834_v12 = vmul.f32 %v1144_v7, %v833_v11 }
 0x544   : > { %v838_v15 = vsel %vm837_vm8, %v1144_v7, %v834_v12 }
 0x545   : > { %v839_v16 = vmul.f32 %v838_v15, %v827_v13 }
 0x547   : > { %v843_v18 = vmul.f32 %v1119_v14, %v839_v16 }
 0x549   : > { %v847_v19 = vadd.f32 %v1120_v17, %v843_v18 }
 0x54b   : > { %1053 = vmatmul.msk.f32.vlgmr.msra.gmra.mxu3 %vm431_vm0, %v847_v19 }
 0x5ce   : > { %v871_v30 = vpop.f32.mrf.mxu3 }
 0x5cf   : > { %v872_v31 = vadd.f32 %v1121_v29, %v871_v30 }
 0x5d1   : > { %v874_v32 = vmul.f32 %v872_v31, %v872_v31 }
 0x5d3   : > { %v875_v33 = vmul.f32 %v874_v32, %v872_v31 }
 0x5d5   : > { %v876_v34 = vmul.f32 0.044715, %v875_v33 }
 0x5d7   : > { %v877_v26 = vadd.f32 %v876_v34, %v872_v31 }
 0x5d9   : > { %v878_v36 = vmul.f32 0.7978846, %v877_v26 }
 0x5db   : > { %1145 = vtanh.f32 %v878_v36 }
 0x5e1   : > { %v1146_v37 = vpop.eup %1145 }
 0x5e2   : > { %v880_v38 = vadd.f32 1.0, %v1146_v37 }
 0x5e4   : > { %v881_v35 = vmul.f32 0.5, %v880_v38 }
 0x5e6   : > { %v882_v39 = vmul.f32 %v881_v35, %v872_v31 }
 0x5e8   : > { %1054 = vmatmul.msk.f32.vlgmr.msrb.gmra.mxu0 %vm886_vm9, %v882_v39 }
 0x665   : > { %v907_v41 = vpop.f32.mrf.mxu0 }
 0x666   : > { %v908_v42 = vadd.f32 %v1122_v40, %v907_v41 }
 0x668   : > { %v910_v43 = vadd.f32 %v908_v42, %v847_v19 }
 0x66a   : > { %v911_v44 = vsel %vm431_vm0, %v910_v43, 0.0  ;;  %v915_v45 = vmul.f32 %v910_v43, %v910_v43 }
 0x66b   : > { %912 = vadd.xlane.f32.xlu1 %v911_v44 }
 0x66c   : > { %v916_v46 = vsel %vm431_vm0, %v915_v45, 0.0 }
 0x66d   : > { %917 = vadd.xlane.f32.xlu0 %v916_v46 }
 0x6de   : > { %v913_v47 = vpop.xlane.xlu1 %912 }
 0x6df   : > { %v914_v48 = vmul.f32 %v913_v47, %v1516_v59 }
 0x6e0   : > { %v918_v49 = vpop.xlane.xlu0 %917 }
 0x6e1   : > { %v920_v50 = vmul.f32 %v914_v48, %v914_v48  ;;  %v919_v51 = vmul.f32 %v918_v49, %v1516_v59  ;;  %v923_v61 = vsub.f32 %v910_v43, %v914_v48  ;;  %v1123_v59 = vld [vmem:[%s1614_s5] ss:$0 sm:$0xff] }
 0x6e3   : > { %v921_v52 = vsub.f32 %v919_v51, %v920_v50 }
 0x6e5   : > { %v922_v53 = vmax.f32 %v921_v52, 0.0 }
 0x6e7   : > { %v924_v54 = vadd.f32 1e-05, %v922_v53 }
 0x6e9   : > { %1147 = vrsqrt.f32 %v924_v54  ;;  %vm931_vm11 = vweird.f32 %v924_v54 }
 0x6ef   : > { %v1148_v55 = vpop.eup %1147 }
 0x6f0   : > { %v926_v56 = vmul.f32 %v1148_v55, %v924_v54  ;;  %vm932_vm10 = vweird.f32 %v1148_v55 }
 0x6f1   : > { %vm933_vm12 = vmor %vm931_vm11, %vm932_vm10 }
 0x6f2   : > { %v927_v57 = vmul.f32 %v1148_v55, %v926_v56 }
 0x6f4   : > { %v928_v58 = vmul.f32 0.5, %v927_v57 }
 0x6f6   : > { %v929_v4 = vsub.f32 1.5, %v928_v58 }
 0x6f8   : > { %v930_v60 = vmul.f32 %v1148_v55, %v929_v4 }
 0x6fa   : > { %v934_v62 = vsel %vm933_vm12, %v1148_v55, %v930_v60 }
 0x6fb   : > { %v935_v63 = vmul.f32 %v934_v62, %v923_v61 }
 0x6fd   : > { %v939_v1 = vmul.f32 %v1123_v59, %v935_v63 }
 0x6ff   : > { %v943_v2 = vadd.f32 %v1124_v0, %v939_v1 }
 0x701   : > { %944 = vst.msk [vmem:[%s403_s21] sm:$0xff] %vm431_vm0, %v943_v2 }
 0x702   : > { %1206 = shalt.err (!%p1203_p4)
}
 0x703   : > { %1061 = dma.vmem_to_hbm [thread:$0]  (%p1366_p11), %s959_s24, 128, %s961_s19, %s946_s23  }
 0x704 PF: > { %s1638_s12 = sld [smem:[#allocation8_spill]]  ;;  %p1640_p7 = scmp.ge.s32.totalorder %s1245_s20, 2 }
 0x706   : > { %p1068_p5 = pnand %p1640_p7, %p1370_p12 }
 0x708   : > { %p1069_p8 = pneg %p1068_p5 }
 0x70a   : > { %s972_s15 = sand.u32 1, %s1638_s12  }
 0x70b   : > { %s973_s16 = scalar_lea.sflag [#allocation4], %s972_s15 }
 0x70c   : > { %1228 = dma.done.wait (%p1069_p8), %s973_s16, 128  }
 0x70d   : > { %1230 = vsyncadd (%p1069_p8), %s973_s16, 4294967168  ;;  %s1641_s20 = sld [smem:[#allocation10_spill]]  ;;  %s1644_s17 = smov %s1237_s18 }
 0x70e   : > { %s1642_s30 = sld [smem:[#allocation9_spill]] }
 0x70f   : > { %s1643_s19 = sld [smem:[#allocation11_spill]] }
 0x713   : > { %p24_p10 = scmp.ge.s32.totalorder %s1641_s20, 4  }
 0x714   : > { %s1645_s18 = smov %s1642_s30 }
 0x715   :  { %26 = sbr.rel (!%p24_p10) target bundleno = 5 (0x5), region = 109 }
 0x71a   :  { %979 = vsyncpa [#allocation3], 1 }
 0x71b   :  { %981 = vsyncpa [#allocation3 + $0x1], 1 }
 0x71c   :  { %982 = vsyncpa [#allocation4], 1 }
 0x71d   :  { %984 = vsyncpa [#allocation4 + $0x1], 1 }

</bundles_post_ra>
